<compile_context>
chip_gen: v6e
topology: v6e:2x2x1
jax: 0.10.0
libtpu: 0.0.40
codegen_flags: <defaults>
</compile_context>

<pallas_src>
import jax
import jax.numpy as jnp
from jax.experimental import pallas as pl
from jax.experimental.pallas import tpu as pltpu

INPUT_DIM = 64
EMBED_DIM = 128
NECK_DIM = 8
BLOCK_SIZE = 16          # only for the (unused) cov_source / cov_target buffers
BN_EPS = 0.001

LANE = 128               # TPU lane width; every layer is zero-padded to this
TILE_N = 256             # batch rows per grid step (>= MXU height on v6e/v7x)

# Layer widths: 5 encoder Linear layers + 5 decoder Linear layers.
_LAYER_DIMS = (
    [(INPUT_DIM, EMBED_DIM)]
    + [(EMBED_DIM, EMBED_DIM)] * 3
    + [(EMBED_DIM, NECK_DIM)]
    + [(NECK_DIM, EMBED_DIM)]
    + [(EMBED_DIM, EMBED_DIM)] * 3
    + [(EMBED_DIM, INPUT_DIM)]
)
_NUM_LAYERS = len(_LAYER_DIMS)          # 10
_NUM_BN_LAYERS = _NUM_LAYERS - 1        # 9 (final decoder Linear has no BN/ReLU)
_NECK_LAYER = 4                         # encoder output (bottleneck z) after this layer


def _round_up(n, m):
    return ((n + m - 1) // m) * m


def aenet_kernel(x_ref, w_ref, b_ref, recon_ref, z_ref):
    """One batch tile of the whole autoencoder.

    x_ref     : (TILE_N, 128) f32   input rows, lanes [0,64) real, rest zero
    w_ref     : (10, 128, 128) bf16 BN-folded, zero-padded weights (x @ W layout)
    b_ref     : (10, 1, 128) f32    BN-folded, zero-padded biases
    recon_ref : (TILE_N, 128) f32   reconstruction, lanes [0,64) real
    z_ref     : (TILE_N, 128) f32   bottleneck, lanes [0,8) real
    """
    h = x_ref[...]                                        # f32 (TILE_N, 128)

    for layer in range(_NUM_LAYERS):                      # unrolled at trace time
        w = w_ref[layer]                                  # (128, 128) bf16
        b = b_ref[layer]                                  # (1, 128)  f32
        # Linear (MXU, bf16 inputs, f32 accumulate) + folded-BN bias
        h = jnp.dot(h.astype(jnp.bfloat16), w,
                    preferred_element_type=jnp.float32) + b
        if layer < _NUM_BN_LAYERS:
            h = jnp.maximum(h, 0.0)                       # ReLU (f32, VPU)
        if layer == _NECK_LAYER:
            z_ref[...] = h.astype(z_ref.dtype)            # padded cols are exactly 0

    recon_ref[...] = h.astype(recon_ref.dtype)


def init_params(key):
    """Synthetic PyTorch-like params with eval-mode BN folded in, padded + stacked.

    Returns:
      w_packed: (10, 128, 128) bf16  -- W'[l] zero-padded; activations use x @ W'.
      b_packed: (10, 1, 128)   f32   -- b'[l] zero-padded.
    """
    w_list, b_list = [], []
    for i, (din, dout) in enumerate(_LAYER_DIMS):
        key, k1, k2, k3, k4 = jax.random.split(key, 5)
        bound = 1.0 / (din ** 0.5)
        w = jax.random.uniform(k1, (din, dout), jnp.float32, -bound, bound)
        b = jax.random.uniform(k2, (dout,), jnp.float32, -bound, bound)
        if i < _NUM_BN_LAYERS:
            # Eval-mode BatchNorm1d with PyTorch-init running stats (mean=0, var=1).
            gamma = 1.0 + 0.1 * jax.random.normal(k3, (dout,), dtype=jnp.float32)
            beta = 0.1 * jax.random.normal(k4, (dout,), dtype=jnp.float32)
            running_mean = jnp.zeros((dout,), jnp.float32)
            running_var = jnp.ones((dout,), jnp.float32)
            scale = gamma / jnp.sqrt(running_var + BN_EPS)
            shift = beta - running_mean * scale
            # Fold BN into the Linear: y*s + t == x @ (W*s) + (b*s + t)
            w = w * scale[None, :]
            b = b * scale + shift
        w_pad = jnp.zeros((LANE, LANE), jnp.float32).at[:din, :dout].set(w)
        b_pad = jnp.zeros((1, LANE), jnp.float32).at[0, :dout].set(b)
        w_list.append(w_pad)
        b_list.append(b_pad)
    w_packed = jnp.stack(w_list).astype(jnp.bfloat16)     # (10, 128, 128)
    b_packed = jnp.stack(b_list)                          # (10, 1, 128) f32
    return w_packed, b_packed


def aenet_forward(x, w_packed, b_packed):
    """Flatten to (N, input_dim), pad batch + lanes, run the tiled Pallas kernel."""
    x2 = x.reshape(-1, INPUT_DIM).astype(jnp.float32)
    n = x2.shape[0]
    n_pad = _round_up(max(n, 1), TILE_N)

    # Lane-dense, batch-padded input slab: (n_pad, 128), real data in [:n, :64].
    x_pad = jnp.zeros((n_pad, LANE), jnp.float32).at[:n, :INPUT_DIM].set(x2)

    grid = (n_pad // TILE_N,)

    row_spec = pl.BlockSpec((TILE_N, LANE), lambda i: (i, 0))
    w_spec = pl.BlockSpec((_NUM_LAYERS, LANE, LANE), lambda i: (0, 0, 0))
    b_spec = pl.BlockSpec((_NUM_LAYERS, 1, LANE), lambda i: (0, 0, 0))

    flops = 2 * n_pad * LANE * LANE * _NUM_LAYERS
    bytes_accessed = (
        x_pad.size * 4 + 2 * n_pad * LANE * 4        # input + two output slabs
        + w_packed.size * 2 + b_packed.size * 4      # resident params
    )

    recon_pad, z_pad = pl.pallas_call(
        aenet_kernel,
        out_shape=(
            jax.ShapeDtypeStruct((n_pad, LANE), jnp.float32),   # padded recon
            jax.ShapeDtypeStruct((n_pad, LANE), jnp.float32),   # padded z
        ),
        grid=grid,
        in_specs=[row_spec, w_spec, b_spec],
        out_specs=(row_spec, row_spec),
        compiler_params=pltpu.CompilerParams(
            dimension_semantics=("parallel",),
        ),
        cost_estimate=pl.CostEstimate(
            flops=flops, transcendentals=0, bytes_accessed=bytes_accessed),
    )(x_pad, w_packed, b_packed)

    recon = recon_pad[:n, :INPUT_DIM]
    z = z_pad[:n, :NECK_DIM]
    return recon, z


def aenet_reference(x, w_packed, b_packed):
    """Pure-JAX reference of the identical (BN-folded, bf16-matmul) forward."""
    x2 = x.reshape(-1, INPUT_DIM).astype(jnp.float32)
    n = x2.shape[0]
    h = jnp.zeros((n, LANE), jnp.float32).at[:, :INPUT_DIM].set(x2)
    z = None
    for layer in range(_NUM_LAYERS):
        h = jnp.dot(h.astype(jnp.bfloat16), w_packed[layer],
                    preferred_element_type=jnp.float32) + b_packed[layer]
        if layer < _NUM_BN_LAYERS:
            h = jnp.maximum(h, 0.0)
        if layer == _NECK_LAYER:
            z = h[:, :NECK_DIM]
    return h[:, :INPUT_DIM], z


if __name__ == "__main__":
    key = jax.random.PRNGKey(0)
    kx, kp = jax.random.split(key)

    # x: (batch=2, frames=8, input_dim=64) -> view(-1, 64) gives N=16 rows.
    x = jax.random.normal(kx, (2, 8, INPUT_DIM), dtype=jnp.float32)

    # cov_source / cov_target exist in the module but are unused in forward();
    # instantiated only to mirror the module's state.
    cov_source = jnp.zeros((BLOCK_SIZE, BLOCK_SIZE), jnp.float32)
    cov_target = jnp.zeros((BLOCK_SIZE, BLOCK_SIZE), jnp.float32)

    w_packed, b_packed = init_params(kp)

    recon, z = aenet_forward(x, w_packed, b_packed)
    jax.block_until_ready((recon, z))

    recon_ref, z_ref = aenet_reference(x, w_packed, b_packed)
    assert recon.shape == (16, INPUT_DIM) and z.shape == (16, NECK_DIM)
    assert jnp.allclose(recon, recon_ref, rtol=1e-2, atol=1e-2)
    assert jnp.allclose(z, z_ref, rtol=1e-2, atol=1e-2)

    print("KERNEL_OK")
</pallas_src>

<mosaic_0001>
module attributes {stable_mosaic.version = 11 : i64} {
  func.func @aenet_kernel(%arg0: i32, %arg1: memref<256x128xf32, #tpu.memory_space<vmem>>, %arg2: memref<10x128x128xbf16, #tpu.memory_space<vmem>>, %arg3: memref<10x1x128xf32, #tpu.memory_space<vmem>>, %arg4: memref<256x128xf32, #tpu.memory_space<vmem>>, %arg5: memref<256x128xf32, #tpu.memory_space<vmem>>) attributes {dimension_semantics = [#tpu.dimension_semantics<parallel>], iteration_bounds = array<i64: 1>, scalar_prefetch = 0 : i64, scratch_operands = 0 : i64, tpu.core_type = #tpu.core_type<tc>, window_params = [{transform_indices = @transform_0, window_bounds = array<i64: 256, 128>}, {pipeline_mode = #tpu.pipeline_mode<synchronous>, transform_indices = @transform_1, window_bounds = array<i64: 10, 128, 128>}, {pipeline_mode = #tpu.pipeline_mode<synchronous>, transform_indices = @transform_2, window_bounds = array<i64: 10, 1, 128>}, {transform_indices = @transform_3, window_bounds = array<i64: 256, 128>}, {transform_indices = @transform_4, window_bounds = array<i64: 256, 128>}]} {
    %c0 = arith.constant 0 : index
    %c0_0 = arith.constant 0 : index
    %0 = vector.load %arg1[%c0, %c0_0] : memref<256x128xf32, #tpu.memory_space<vmem>>, vector<256x128xf32>
    %c0_1 = arith.constant 0 : index
    %c0_2 = arith.constant 0 : index
    %c0_3 = arith.constant 0 : index
    %1 = vector.load %arg2[%c0_1, %c0_2, %c0_3] : memref<10x128x128xbf16, #tpu.memory_space<vmem>>, vector<1x128x128xbf16>
    %2 = vector.shape_cast %1 : vector<1x128x128xbf16> to vector<128x128xbf16>
    %c0_4 = arith.constant 0 : index
    %c0_5 = arith.constant 0 : index
    %c0_6 = arith.constant 0 : index
    %3 = vector.load %arg3[%c0_4, %c0_5, %c0_6] : memref<10x1x128xf32, #tpu.memory_space<vmem>>, vector<1x1x128xf32>
    %4 = vector.shape_cast %3 : vector<1x1x128xf32> to vector<1x128xf32>
    %5 = arith.truncf %0 : vector<256x128xf32> to vector<256x128xbf16>
    %cst = arith.constant dense<0.000000e+00> : vector<256x128xf32>
    %6 = tpu.matmul %5, %2, %cst {dimension_numbers = #tpu.dot_dimension_numbers<[1], [0], [0], [1], [0, 0, 1, 1], [], []>} : vector<256x128xbf16>, vector<128x128xbf16>, vector<256x128xf32> -> vector<256x128xf32>
    %7 = vector.broadcast %4 : vector<1x128xf32> to vector<256x128xf32>
    %8 = arith.addf %6, %7 : vector<256x128xf32>
    %cst_7 = arith.constant 0.000000e+00 : f32
    %9 = vector.broadcast %cst_7 : f32 to vector<256x128xf32>
    %10 = arith.maximumf %8, %9 : vector<256x128xf32>
    %c1 = arith.constant 1 : index
    %c0_8 = arith.constant 0 : index
    %c0_9 = arith.constant 0 : index
    %11 = vector.load %arg2[%c1, %c0_8, %c0_9] : memref<10x128x128xbf16, #tpu.memory_space<vmem>>, vector<1x128x128xbf16>
    %12 = vector.shape_cast %11 : vector<1x128x128xbf16> to vector<128x128xbf16>
    %c1_10 = arith.constant 1 : index
    %c0_11 = arith.constant 0 : index
    %c0_12 = arith.constant 0 : index
    %13 = vector.load %arg3[%c1_10, %c0_11, %c0_12] : memref<10x1x128xf32, #tpu.memory_space<vmem>>, vector<1x1x128xf32>
    %14 = vector.shape_cast %13 : vector<1x1x128xf32> to vector<1x128xf32>
    %15 = arith.truncf %10 : vector<256x128xf32> to vector<256x128xbf16>
    %cst_13 = arith.constant dense<0.000000e+00> : vector<256x128xf32>
    %16 = tpu.matmul %15, %12, %cst_13 {dimension_numbers = #tpu.dot_dimension_numbers<[1], [0], [0], [1], [0, 0, 1, 1], [], []>} : vector<256x128xbf16>, vector<128x128xbf16>, vector<256x128xf32> -> vector<256x128xf32>
    %17 = vector.broadcast %14 : vector<1x128xf32> to vector<256x128xf32>
    %18 = arith.addf %16, %17 : vector<256x128xf32>
    %cst_14 = arith.constant 0.000000e+00 : f32
    %19 = vector.broadcast %cst_14 : f32 to vector<256x128xf32>
    %20 = arith.maximumf %18, %19 : vector<256x128xf32>
    %c2 = arith.constant 2 : index
    %c0_15 = arith.constant 0 : index
    %c0_16 = arith.constant 0 : index
    %21 = vector.load %arg2[%c2, %c0_15, %c0_16] : memref<10x128x128xbf16, #tpu.memory_space<vmem>>, vector<1x128x128xbf16>
    %22 = vector.shape_cast %21 : vector<1x128x128xbf16> to vector<128x128xbf16>
    %c2_17 = arith.constant 2 : index
    %c0_18 = arith.constant 0 : index
    %c0_19 = arith.constant 0 : index
    %23 = vector.load %arg3[%c2_17, %c0_18, %c0_19] : memref<10x1x128xf32, #tpu.memory_space<vmem>>, vector<1x1x128xf32>
    %24 = vector.shape_cast %23 : vector<1x1x128xf32> to vector<1x128xf32>
    %25 = arith.truncf %20 : vector<256x128xf32> to vector<256x128xbf16>
    %cst_20 = arith.constant dense<0.000000e+00> : vector<256x128xf32>
    %26 = tpu.matmul %25, %22, %cst_20 {dimension_numbers = #tpu.dot_dimension_numbers<[1], [0], [0], [1], [0, 0, 1, 1], [], []>} : vector<256x128xbf16>, vector<128x128xbf16>, vector<256x128xf32> -> vector<256x128xf32>
    %27 = vector.broadcast %24 : vector<1x128xf32> to vector<256x128xf32>
    %28 = arith.addf %26, %27 : vector<256x128xf32>
    %cst_21 = arith.constant 0.000000e+00 : f32
    %29 = vector.broadcast %cst_21 : f32 to vector<256x128xf32>
    %30 = arith.maximumf %28, %29 : vector<256x128xf32>
    %c3 = arith.constant 3 : index
    %c0_22 = arith.constant 0 : index
    %c0_23 = arith.constant 0 : index
    %31 = vector.load %arg2[%c3, %c0_22, %c0_23] : memref<10x128x128xbf16, #tpu.memory_space<vmem>>, vector<1x128x128xbf16>
    %32 = vector.shape_cast %31 : vector<1x128x128xbf16> to vector<128x128xbf16>
    %c3_24 = arith.constant 3 : index
    %c0_25 = arith.constant 0 : index
    %c0_26 = arith.constant 0 : index
    %33 = vector.load %arg3[%c3_24, %c0_25, %c0_26] : memref<10x1x128xf32, #tpu.memory_space<vmem>>, vector<1x1x128xf32>
    %34 = vector.shape_cast %33 : vector<1x1x128xf32> to vector<1x128xf32>
    %35 = arith.truncf %30 : vector<256x128xf32> to vector<256x128xbf16>
    %cst_27 = arith.constant dense<0.000000e+00> : vector<256x128xf32>
    %36 = tpu.matmul %35, %32, %cst_27 {dimension_numbers = #tpu.dot_dimension_numbers<[1], [0], [0], [1], [0, 0, 1, 1], [], []>} : vector<256x128xbf16>, vector<128x128xbf16>, vector<256x128xf32> -> vector<256x128xf32>
    %37 = vector.broadcast %34 : vector<1x128xf32> to vector<256x128xf32>
    %38 = arith.addf %36, %37 : vector<256x128xf32>
    %cst_28 = arith.constant 0.000000e+00 : f32
    %39 = vector.broadcast %cst_28 : f32 to vector<256x128xf32>
    %40 = arith.maximumf %38, %39 : vector<256x128xf32>
    %c4 = arith.constant 4 : index
    %c0_29 = arith.constant 0 : index
    %c0_30 = arith.constant 0 : index
    %41 = vector.load %arg2[%c4, %c0_29, %c0_30] : memref<10x128x128xbf16, #tpu.memory_space<vmem>>, vector<1x128x128xbf16>
    %42 = vector.shape_cast %41 : vector<1x128x128xbf16> to vector<128x128xbf16>
    %c4_31 = arith.constant 4 : index
    %c0_32 = arith.constant 0 : index
    %c0_33 = arith.constant 0 : index
    %43 = vector.load %arg3[%c4_31, %c0_32, %c0_33] : memref<10x1x128xf32, #tpu.memory_space<vmem>>, vector<1x1x128xf32>
    %44 = vector.shape_cast %43 : vector<1x1x128xf32> to vector<1x128xf32>
    %45 = arith.truncf %40 : vector<256x128xf32> to vector<256x128xbf16>
    %cst_34 = arith.constant dense<0.000000e+00> : vector<256x128xf32>
    %46 = tpu.matmul %45, %42, %cst_34 {dimension_numbers = #tpu.dot_dimension_numbers<[1], [0], [0], [1], [0, 0, 1, 1], [], []>} : vector<256x128xbf16>, vector<128x128xbf16>, vector<256x128xf32> -> vector<256x128xf32>
    %47 = vector.broadcast %44 : vector<1x128xf32> to vector<256x128xf32>
    %48 = arith.addf %46, %47 : vector<256x128xf32>
    %cst_35 = arith.constant 0.000000e+00 : f32
    %49 = vector.broadcast %cst_35 : f32 to vector<256x128xf32>
    %50 = arith.maximumf %48, %49 : vector<256x128xf32>
    %c0_36 = arith.constant 0 : index
    %c0_37 = arith.constant 0 : index
    %51 = vector.load %arg5[%c0_36, %c0_37] : memref<256x128xf32, #tpu.memory_space<vmem>>, vector<256x128xf32>
    tpu.vector_store %arg5[%c0_36, %c0_37], %50 {strides = array<i32>} : memref<256x128xf32, #tpu.memory_space<vmem>>, vector<256x128xf32>,
    %c5 = arith.constant 5 : index
    %c0_38 = arith.constant 0 : index
    %c0_39 = arith.constant 0 : index
    %52 = vector.load %arg2[%c5, %c0_38, %c0_39] : memref<10x128x128xbf16, #tpu.memory_space<vmem>>, vector<1x128x128xbf16>
    %53 = vector.shape_cast %52 : vector<1x128x128xbf16> to vector<128x128xbf16>
    %c5_40 = arith.constant 5 : index
    %c0_41 = arith.constant 0 : index
    %c0_42 = arith.constant 0 : index
    %54 = vector.load %arg3[%c5_40, %c0_41, %c0_42] : memref<10x1x128xf32, #tpu.memory_space<vmem>>, vector<1x1x128xf32>
    %55 = vector.shape_cast %54 : vector<1x1x128xf32> to vector<1x128xf32>
    %56 = arith.truncf %50 : vector<256x128xf32> to vector<256x128xbf16>
    %cst_43 = arith.constant dense<0.000000e+00> : vector<256x128xf32>
    %57 = tpu.matmul %56, %53, %cst_43 {dimension_numbers = #tpu.dot_dimension_numbers<[1], [0], [0], [1], [0, 0, 1, 1], [], []>} : vector<256x128xbf16>, vector<128x128xbf16>, vector<256x128xf32> -> vector<256x128xf32>
    %58 = vector.broadcast %55 : vector<1x128xf32> to vector<256x128xf32>
    %59 = arith.addf %57, %58 : vector<256x128xf32>
    %cst_44 = arith.constant 0.000000e+00 : f32
    %60 = vector.broadcast %cst_44 : f32 to vector<256x128xf32>
    %61 = arith.maximumf %59, %60 : vector<256x128xf32>
    %c6 = arith.constant 6 : index
    %c0_45 = arith.constant 0 : index
    %c0_46 = arith.constant 0 : index
    %62 = vector.load %arg2[%c6, %c0_45, %c0_46] : memref<10x128x128xbf16, #tpu.memory_space<vmem>>, vector<1x128x128xbf16>
    %63 = vector.shape_cast %62 : vector<1x128x128xbf16> to vector<128x128xbf16>
    %c6_47 = arith.constant 6 : index
    %c0_48 = arith.constant 0 : index
    %c0_49 = arith.constant 0 : index
    %64 = vector.load %arg3[%c6_47, %c0_48, %c0_49] : memref<10x1x128xf32, #tpu.memory_space<vmem>>, vector<1x1x128xf32>
    %65 = vector.shape_cast %64 : vector<1x1x128xf32> to vector<1x128xf32>
    %66 = arith.truncf %61 : vector<256x128xf32> to vector<256x128xbf16>
    %cst_50 = arith.constant dense<0.000000e+00> : vector<256x128xf32>
    %67 = tpu.matmul %66, %63, %cst_50 {dimension_numbers = #tpu.dot_dimension_numbers<[1], [0], [0], [1], [0, 0, 1, 1], [], []>} : vector<256x128xbf16>, vector<128x128xbf16>, vector<256x128xf32> -> vector<256x128xf32>
    %68 = vector.broadcast %65 : vector<1x128xf32> to vector<256x128xf32>
    %69 = arith.addf %67, %68 : vector<256x128xf32>
    %cst_51 = arith.constant 0.000000e+00 : f32
    %70 = vector.broadcast %cst_51 : f32 to vector<256x128xf32>
    %71 = arith.maximumf %69, %70 : vector<256x128xf32>
    %c7 = arith.constant 7 : index
    %c0_52 = arith.constant 0 : index
    %c0_53 = arith.constant 0 : index
    %72 = vector.load %arg2[%c7, %c0_52, %c0_53] : memref<10x128x128xbf16, #tpu.memory_space<vmem>>, vector<1x128x128xbf16>
    %73 = vector.shape_cast %72 : vector<1x128x128xbf16> to vector<128x128xbf16>
    %c7_54 = arith.constant 7 : index
    %c0_55 = arith.constant 0 : index
    %c0_56 = arith.constant 0 : index
    %74 = vector.load %arg3[%c7_54, %c0_55, %c0_56] : memref<10x1x128xf32, #tpu.memory_space<vmem>>, vector<1x1x128xf32>
    %75 = vector.shape_cast %74 : vector<1x1x128xf32> to vector<1x128xf32>
    %76 = arith.truncf %71 : vector<256x128xf32> to vector<256x128xbf16>
    %cst_57 = arith.constant dense<0.000000e+00> : vector<256x128xf32>
    %77 = tpu.matmul %76, %73, %cst_57 {dimension_numbers = #tpu.dot_dimension_numbers<[1], [0], [0], [1], [0, 0, 1, 1], [], []>} : vector<256x128xbf16>, vector<128x128xbf16>, vector<256x128xf32> -> vector<256x128xf32>
    %78 = vector.broadcast %75 : vector<1x128xf32> to vector<256x128xf32>
    %79 = arith.addf %77, %78 : vector<256x128xf32>
    %cst_58 = arith.constant 0.000000e+00 : f32
    %80 = vector.broadcast %cst_58 : f32 to vector<256x128xf32>
    %81 = arith.maximumf %79, %80 : vector<256x128xf32>
    %c8 = arith.constant 8 : index
    %c0_59 = arith.constant 0 : index
    %c0_60 = arith.constant 0 : index
    %82 = vector.load %arg2[%c8, %c0_59, %c0_60] : memref<10x128x128xbf16, #tpu.memory_space<vmem>>, vector<1x128x128xbf16>
    %83 = vector.shape_cast %82 : vector<1x128x128xbf16> to vector<128x128xbf16>
    %c8_61 = arith.constant 8 : index
    %c0_62 = arith.constant 0 : index
    %c0_63 = arith.constant 0 : index
    %84 = vector.load %arg3[%c8_61, %c0_62, %c0_63] : memref<10x1x128xf32, #tpu.memory_space<vmem>>, vector<1x1x128xf32>
    %85 = vector.shape_cast %84 : vector<1x1x128xf32> to vector<1x128xf32>
    %86 = arith.truncf %81 : vector<256x128xf32> to vector<256x128xbf16>
    %cst_64 = arith.constant dense<0.000000e+00> : vector<256x128xf32>
    %87 = tpu.matmul %86, %83, %cst_64 {dimension_numbers = #tpu.dot_dimension_numbers<[1], [0], [0], [1], [0, 0, 1, 1], [], []>} : vector<256x128xbf16>, vector<128x128xbf16>, vector<256x128xf32> -> vector<256x128xf32>
    %88 = vector.broadcast %85 : vector<1x128xf32> to vector<256x128xf32>
    %89 = arith.addf %87, %88 : vector<256x128xf32>
    %cst_65 = arith.constant 0.000000e+00 : f32
    %90 = vector.broadcast %cst_65 : f32 to vector<256x128xf32>
    %91 = arith.maximumf %89, %90 : vector<256x128xf32>
    %c9 = arith.constant 9 : index
    %c0_66 = arith.constant 0 : index
    %c0_67 = arith.constant 0 : index
    %92 = vector.load %arg2[%c9, %c0_66, %c0_67] : memref<10x128x128xbf16, #tpu.memory_space<vmem>>, vector<1x128x128xbf16>
    %93 = vector.shape_cast %92 : vector<1x128x128xbf16> to vector<128x128xbf16>
    %c9_68 = arith.constant 9 : index
    %c0_69 = arith.constant 0 : index
    %c0_70 = arith.constant 0 : index
    %94 = vector.load %arg3[%c9_68, %c0_69, %c0_70] : memref<10x1x128xf32, #tpu.memory_space<vmem>>, vector<1x1x128xf32>
    %95 = vector.shape_cast %94 : vector<1x1x128xf32> to vector<1x128xf32>
    %96 = arith.truncf %91 : vector<256x128xf32> to vector<256x128xbf16>
    %cst_71 = arith.constant dense<0.000000e+00> : vector<256x128xf32>
    %97 = tpu.matmul %96, %93, %cst_71 {dimension_numbers = #tpu.dot_dimension_numbers<[1], [0], [0], [1], [0, 0, 1, 1], [], []>} : vector<256x128xbf16>, vector<128x128xbf16>, vector<256x128xf32> -> vector<256x128xf32>
    %98 = vector.broadcast %95 : vector<1x128xf32> to vector<256x128xf32>
    %99 = arith.addf %97, %98 : vector<256x128xf32>
    %c0_72 = arith.constant 0 : index
    %c0_73 = arith.constant 0 : index
    %100 = vector.load %arg4[%c0_72, %c0_73] : memref<256x128xf32, #tpu.memory_space<vmem>>, vector<256x128xf32>
    tpu.vector_store %arg4[%c0_72, %c0_73], %99 {strides = array<i32>} : memref<256x128xf32, #tpu.memory_space<vmem>>, vector<256x128xf32>,
    return
  }
  func.func @transform_0(%arg0: i32) -> (i32, i32) {
    %c0_i32 = arith.constant 0 : i32
    %c0_i32_0 = arith.constant 0 : i32
    return %arg0, %c0_i32 : i32, i32
  }
  func.func @transform_1(%arg0: i32) -> (i32, i32, i32) {
    %c0_i32 = arith.constant 0 : i32
    %c0_i32_0 = arith.constant 0 : i32
    %c0_i32_1 = arith.constant 0 : i32
    %c0_i32_2 = arith.constant 0 : i32
    return %c0_i32, %c0_i32_0, %c0_i32_1 : i32, i32, i32
  }
  func.func @transform_2(%arg0: i32) -> (i32, i32, i32) {
    %c0_i32 = arith.constant 0 : i32
    %c0_i32_0 = arith.constant 0 : i32
    %c0_i32_1 = arith.constant 0 : i32
    %c0_i32_2 = arith.constant 0 : i32
    return %c0_i32, %c0_i32_0, %c0_i32_1 : i32, i32, i32
  }
  func.func @transform_3(%arg0: i32) -> (i32, i32) {
    %c0_i32 = arith.constant 0 : i32
    %c0_i32_0 = arith.constant 0 : i32
    return %arg0, %c0_i32 : i32, i32
  }
  func.func @transform_4(%arg0: i32) -> (i32, i32) {
    %c0_i32 = arith.constant 0 : i32
    %c0_i32_0 = arith.constant 0 : i32
    return %arg0, %c0_i32 : i32, i32
  }
}

</mosaic_0001>

<bundles_post_ra>
// kernel: tpu_custom_call.1
= control target key start
LH: loop header
LB: loop body
LE: loop exit
PB: predicated region body
PF: predicated region fallthrough
CT: control target
= control target key end

     0   :  { %10 = vsyncpa [#allocation3], 0  ;;  %s4385_s0 = inlined_call_operand.hbm [shape: f32[256,128], index: 0, kind: input, shape index: {}]   ;;  %s4386_s1 = inlined_call_operand.hbm [shape: bf16[10,128,128], index: 1, kind: input, shape index: {}]   ;;  %s4387_s2 = inlined_call_operand.hbm [shape: f32[10,1,128], index: 2, kind: input, shape index: {}]   ;;  %s4388_s3 = inlined_call_operand.hbm [shape: f32[256,128], index: 3, kind: output, shape index: {0}]   ;;  %s4389_s4 = inlined_call_operand.hbm [shape: f32[256,128], index: 4, kind: output, shape index: {1}]  }
   0x1   :  { %11 = vsyncpa [#allocation6], 0 }
   0x2   :  { %12 = vsyncpa [#allocation4], 0 }
   0x3   :  { %13 = vsyncpa [#allocation10], 0  ;;  %s3985_s15 = smov [#allocation5]  }
   0x4   :  { %s31_s16 = sshll.u32 %s3985_s15, 4  ;;  %s32_s16 = int_to_ptr.vmem [resolvable:$true] %s31_s16 }
   0x5   :  { %s3885_s17 = scalar_lea.vmem %s32_s16, 10240  ;;  %p3890_p1 = scmp.lt.s32.totalorder %s32_s16, %s32_s16 }
   0x6   :  { %p3886_p0 = scmp.ne.s32.totalorder %s32_s16, %s3885_s17  ;;  %p3891_p2 = scmp.lt.s32.totalorder %s3885_s17, %s3885_s17 }
   0x8   :  { %p3892_p3 = por %p3891_p2, %p3890_p1 }
   0xa   :  { %p3893_p4 = pnand %p3892_p3, %p3886_p0 }
   0xc   :  { %3896 = shalt.err (!%p3893_p4)
}
   0xd   :  { %s3986_s18 = smov 64   ;;  %s3987_s19 = smov 4  }
   0xe   :  { %37 = dma.hbm_to_vmem [thread:$0]  %s4386_s1, 10240, %s32_s16, [#allocation6], %s3986_s18, %s3986_s18, %s3987_s19  }
   0xf   :  { %s3988_s22 = smov [#allocation2]  }
  0x10   :  { %s19_s23 = sshll.u32 %s3988_s22, 4  ;;  %s20_s23 = int_to_ptr.vmem [resolvable:$true] %s19_s23 }
  0x11   :  { %s3905_s24 = scalar_lea.vmem %s20_s23, 4096  ;;  %p3910_p6 = scmp.lt.s32.totalorder %s20_s23, %s20_s23 }
  0x12   :  { %p3906_p5 = scmp.ne.s32.totalorder %s20_s23, %s3905_s24  ;;  %p3911_p7 = scmp.lt.s32.totalorder %s3905_s24, %s3905_s24 }
  0x14   :  { %p3912_p8 = por %p3911_p7, %p3910_p6 }
  0x16   :  { %p3913_p9 = pnand %p3912_p8, %p3906_p5 }
  0x18   :  { %3916 = shalt.err (!%p3913_p9)
}
  0x19   :  { %s3989_s25 = smov 128   ;;  %s3990_s26 = smov 8  }
  0x1a   :  { %25 = dma.hbm_to_vmem [thread:$0]  %s4385_s0, 4096, %s20_s23, [#allocation3], %s3989_s25, %s3989_s25, %s3990_s26  }
  0x1b   :  { %s3991_s1 = smov [#allocation7]  }
  0x1c   :  { %s43_s29 = sshll.u32 %s3991_s1, 4  ;;  %s44_s29 = int_to_ptr.vmem [resolvable:$true] %s43_s29 }
  0x1d   :  { %s3925_s30 = scalar_lea.vmem %s44_s29, 160  ;;  %p3930_p11 = scmp.lt.s32.totalorder %s44_s29, %s44_s29 }
  0x1e   :  { %p3926_p10 = scmp.ne.s32.totalorder %s44_s29, %s3925_s30  ;;  %p3931_p12 = scmp.lt.s32.totalorder %s3925_s30, %s3925_s30 }
  0x20   :  { %p3932_p13 = por %p3931_p12, %p3930_p11 }
  0x22   :  { %p3933_p0 = pnand %p3932_p13, %p3926_p10 }
  0x24   :  { %3936 = shalt.err (!%p3933_p0)
}
  0x25   :  { %s3992_s5 = smov 16   ;;  %s3993_s6 = smov 1  }
  0x26   :  { %49 = dma.hbm_to_vmem [thread:$0]  %s4387_s2, 160, %s44_s29, [#allocation6], %s3992_s5, %s3992_s5, %s3993_s6  }
  0x27   :  { %3977 = dma.done.wait [#allocation3], 4096  }
  0x28   :  { %3978 = vsyncadd [#allocation3], 4294963200 }
  0x29   :  { %3979 = dma.done.wait [#allocation6], 10400  }
  0x2a   :  { %3980 = vsyncadd [#allocation6], 4294956896  ;;  %v3797_v0 = vld [vmem:[#allocation5 + $0x38] sm:$0xff]   ;;  %v3798_v1 = vld [vmem:[#allocation5 + $0x30] sm:$0xff]   ;;  %s3994_s0 = smov [#allocation9]  }
  0x2b   :  { %3306 = vmatprep.subr.bf16.mxu0 %v3797_v0  ;;  %v3799_v2 = vld [vmem:[#allocation5 + $0x28] sm:$0xff]   ;;  %v3800_v3 = vld [vmem:[#allocation5 + $0x20] sm:$0xff]   ;;  %v3801_v7 = vld [vmem:[#allocation5 + $0x18] sm:$0xff]   ;;  %s2959_s2 = sshll.u32 %s3994_s0, 4  ;;  %s2960_s2 = int_to_ptr.vmem [resolvable:$true] %s2959_s2 }
  0x2c   :  { %3307 = vmatpush3.bf16.msra.mxu0 %v3797_v0  ;;  %v60_v4 = vld [vmem:[#allocation2] sm:$0xff]  ;;  %v61_v5 = vld [vmem:[#allocation2 + $0x8] sm:$0xff]  ;;  %v3802_v8 = vld [vmem:[#allocation5 + $0x10] sm:$0xff]   ;;  %s3937_s9 = scalar_lea.vmem %s2960_s2, 4096  ;;  %p3942_p2 = scmp.lt.s32.totalorder %s2960_s2, %s2960_s2 }
  0x2d   :  { %3308 = vmatprep.subr.bf16.mxu0 %v3798_v1  ;;  %v109_v6 = vpack.c.bf16 %v61_v5, %v60_v4  ;;  %v3803_v9 = vld [vmem:[#allocation5 + $0x8] sm:$0xff]   ;;  %v3805_v10 = vld [vmem:[#allocation5 + $0x78] sm:$0xff]   ;;  %v3806_v11 = vld [vmem:[#allocation5 + $0x70] sm:$0xff]   ;;  %p3938_p1 = scmp.ne.s32.totalorder %s2960_s2, %s3937_s9  ;;  %p3943_p3 = scmp.lt.s32.totalorder %s3937_s9, %s3937_s9 }
  0x2e   :  { %3354 = vmatprep.subr.bf16.mxu1 %v3805_v10  ;;  %v3804_v12 = vld [vmem:[#allocation5] sm:$0xff]   ;;  %v3807_v13 = vld [vmem:[#allocation5 + $0x68] sm:$0xff]   ;;  %v62_v14 = vld [vmem:[#allocation2 + $0x10] sm:$0xff] }
  0x2f   :  { %3322 = vmatprep.mubr.bf16.mxu0 %v109_v6  ;;  %3355 = vmatpush3.bf16.msra.mxu1 %v3805_v10  ;;  %v63_v15 = vld [vmem:[#allocation2 + $0x18] sm:$0xff]  ;;  %v3808_v16 = vld [vmem:[#allocation5 + $0x60] sm:$0xff]   ;;  %v65_v18 = vld [vmem:[#allocation2 + $0x28] sm:$0xff]  ;;  %p3944_p4 = por %p3943_p3, %p3942_p2 }
  0x30   :  { %3309 = vmatpush3.bf16.msra.mxu0 %v3798_v1  ;;  %3356 = vmatprep.subr.bf16.mxu1 %v3806_v11  ;;  %v64_v17 = vld [vmem:[#allocation2 + $0x20] sm:$0xff]  ;;  %v3809_v19 = vld [vmem:[#allocation5 + $0x58] sm:$0xff]   ;;  %v110_v20 = vpack.c.bf16 %v63_v15, %v62_v14  ;;  %v66_v22 = vld [vmem:[#allocation2 + $0x30] sm:$0xff] }
  0x31   :  { %3310 = vmatprep.subr.bf16.mxu0 %v3799_v2  ;;  %v111_v21 = vpack.c.bf16 %v65_v18, %v64_v17  ;;  %v67_v23 = vld [vmem:[#allocation2 + $0x38] sm:$0xff]  ;;  %v68_v24 = vld [vmem:[#allocation2 + $0x40] sm:$0xff]  ;;  %v69_v25 = vld [vmem:[#allocation2 + $0x48] sm:$0xff]  ;;  %p3945_p5 = pnand %p3944_p4, %p3938_p1 }
  0x32   :  { %v112_v26 = vpack.c.bf16 %v67_v23, %v66_v22  ;;  %v113_v27 = vpack.c.bf16 %v69_v25, %v68_v24  ;;  %v70_v28 = vld [vmem:[#allocation2 + $0x50] sm:$0xff]  ;;  %v71_v29 = vld [vmem:[#allocation2 + $0x58] sm:$0xff]  ;;  %v72_v30 = vld [vmem:[#allocation2 + $0x60] sm:$0xff] }
  0x33   :  { %3357 = vmatpush3.bf16.msra.mxu1 %v3806_v11  ;;  %v73_v31 = vld [vmem:[#allocation2 + $0x68] sm:$0xff]  ;;  %v114_v32 = vpack.c.bf16 %v71_v29, %v70_v28  ;;  %v74_v34 = vld [vmem:[#allocation2 + $0x70] sm:$0xff]  ;;  %v75_v35 = vld [vmem:[#allocation2 + $0x78] sm:$0xff] }
  0x34   :  { %3311 = vmatpush3.bf16.msra.mxu0 %v3799_v2  ;;  %3358 = vmatprep.subr.bf16.mxu1 %v3807_v13  ;;  %v115_v33 = vpack.c.bf16 %v73_v31, %v72_v30  ;;  %v76_v36 = vld [vmem:[#allocation2 + $0x80] sm:$0xff]  ;;  %v77_v37 = vld [vmem:[#allocation2 + $0x88] sm:$0xff]  ;;  %v116_v38 = vpack.c.bf16 %v75_v35, %v74_v34  ;;  %v78_v40 = vld [vmem:[#allocation2 + $0x90] sm:$0xff] }
  0x35   :  { %3312 = vmatprep.subr.bf16.mxu0 %v3800_v3  ;;  %v117_v39 = vpack.c.bf16 %v77_v37, %v76_v36  ;;  %v79_v41 = vld [vmem:[#allocation2 + $0x98] sm:$0xff]  ;;  %v80_v42 = vld [vmem:[#allocation2 + $0xa0] sm:$0xff]  ;;  %v81_v43 = vld [vmem:[#allocation2 + $0xa8] sm:$0xff] }
  0x36   :  { %v118_v44 = vpack.c.bf16 %v79_v41, %v78_v40  ;;  %v119_v45 = vpack.c.bf16 %v81_v43, %v80_v42  ;;  %v82_v46 = vld [vmem:[#allocation2 + $0xb0] sm:$0xff]  ;;  %v83_v47 = vld [vmem:[#allocation2 + $0xb8] sm:$0xff]  ;;  %v84_v48 = vld [vmem:[#allocation2 + $0xc0] sm:$0xff] }
  0x37   :  { %3359 = vmatpush3.bf16.msra.mxu1 %v3807_v13  ;;  %v85_v49 = vld [vmem:[#allocation2 + $0xc8] sm:$0xff]  ;;  %v120_v50 = vpack.c.bf16 %v83_v47, %v82_v46  ;;  %v86_v52 = vld [vmem:[#allocation2 + $0xd0] sm:$0xff]  ;;  %v87_v53 = vld [vmem:[#allocation2 + $0xd8] sm:$0xff] }
  0x38   :  { %3313 = vmatpush3.bf16.msra.mxu0 %v3800_v3  ;;  %3360 = vmatprep.subr.bf16.mxu1 %v3808_v16  ;;  %v121_v51 = vpack.c.bf16 %v85_v49, %v84_v48  ;;  %v88_v54 = vld [vmem:[#allocation2 + $0xe0] sm:$0xff]  ;;  %v89_v55 = vld [vmem:[#allocation2 + $0xe8] sm:$0xff]  ;;  %v122_v56 = vpack.c.bf16 %v87_v53, %v86_v52  ;;  %v90_v58 = vld [vmem:[#allocation2 + $0xf0] sm:$0xff] }
  0x39   :  { %3314 = vmatprep.subr.bf16.mxu0 %v3801_v7  ;;  %v123_v57 = vpack.c.bf16 %v89_v55, %v88_v54  ;;  %v91_v59 = vld [vmem:[#allocation2 + $0xf8] sm:$0xff]  ;;  %v3810_v61 = vld [vmem:[#allocation5 + $0x50] sm:$0xff]   ;;  %v3811_v62 = vld [vmem:[#allocation5 + $0x48] sm:$0xff]  }
  0x3a   :  { %v124_v60 = vpack.c.bf16 %v91_v59, %v90_v58  ;;  %v3812_v63 = vld [vmem:[#allocation5 + $0x40] sm:$0xff]   ;;  %v3813_v0 = vld [vmem:[#allocation5 + $0xb8] sm:$0xff]   ;;  %v3814_v1 = vld [vmem:[#allocation5 + $0xb0] sm:$0xff]  }
  0x3b   :  { %3361 = vmatpush3.bf16.msra.mxu1 %v3808_v16  ;;  %v3815_v2 = vld [vmem:[#allocation5 + $0xa8] sm:$0xff]   ;;  %v3816_v3 = vld [vmem:[#allocation5 + $0xa0] sm:$0xff]   ;;  %v3817_v4 = vld [vmem:[#allocation5 + $0x98] sm:$0xff]  }
  0x3c   :  { %3315 = vmatpush3.bf16.msra.mxu0 %v3801_v7  ;;  %3362 = vmatprep.subr.bf16.mxu1 %v3809_v19  ;;  %v3818_v5 = vld [vmem:[#allocation5 + $0x90] sm:$0xff]   ;;  %v3819_v6 = vld [vmem:[#allocation5 + $0x88] sm:$0xff]  }
  0x3d   :  { %3316 = vmatprep.subr.bf16.mxu0 %v3802_v8 }
  0x3f   :  { %3363 = vmatpush3.bf16.msra.mxu1 %v3809_v19 }
  0x40   :  { %3317 = vmatpush3.bf16.msra.mxu0 %v3802_v8  ;;  %3364 = vmatprep.subr.bf16.mxu1 %v3810_v61 }
  0x41   :  { %3318 = vmatprep.subr.bf16.mxu0 %v3803_v9 }
  0x43   :  { %3365 = vmatpush3.bf16.msra.mxu1 %v3810_v61 }
  0x44   :  { %3319 = vmatpush3.bf16.msra.mxu0 %v3803_v9  ;;  %3366 = vmatprep.subr.bf16.mxu1 %v3811_v62  ;;  %v4033_v9 = vld [vmem:[#allocation7] ss:$0 sm:$0xff] }
  0x45   :  { %3320 = vmatprep.subr.bf16.mxu0 %v3804_v12 }
  0x47   :  { %3367 = vmatpush3.bf16.msra.mxu1 %v3811_v62 }
  0x48   :  { %3321 = vmatpush3.bf16.msra.mxu0 %v3804_v12  ;;  %3368 = vmatprep.subr.bf16.mxu1 %v3812_v63 }
  0x49   :  { %3402 = vmatprep.subr.bf16.mxu0 %v3813_v0 }
  0x4b   :  { %3323 = vmatmul.mubr.bf16.vlgmr.msra.gmra.mxu0 %v110_v20  ;;  %3369 = vmatpush3.bf16.msra.mxu1 %v3812_v63 }
  0x4c   :  { %3326 = vmatprep.mubr.bf16.mxu0 %v111_v21  ;;  %3403 = vmatpush3.bf16.msra.mxu0 %v3813_v0 }
  0x4d   :  { %3404 = vmatprep.subr.bf16.mxu0 %v3814_v1 }
  0x50   :  { %3405 = vmatpush3.bf16.msra.mxu0 %v3814_v1 }
  0x51   :  { %3406 = vmatprep.subr.bf16.mxu0 %v3815_v2 }
  0x53   :  { %3327 = vmatmul.mubr.bf16.gmra.mxu0 %v112_v26 }
  0x54   :  { %3330 = vmatprep.mubr.bf16.mxu0 %v113_v27  ;;  %3407 = vmatpush3.bf16.msra.mxu0 %v3815_v2 }
  0x55   :  { %3408 = vmatprep.subr.bf16.mxu0 %v3816_v3 }
  0x58   :  { %3409 = vmatpush3.bf16.msra.mxu0 %v3816_v3 }
  0x59   :  { %3410 = vmatprep.subr.bf16.mxu0 %v3817_v4 }
  0x5b   :  { %3331 = vmatmul.mubr.bf16.gmra.mxu0 %v114_v32 }
  0x5c   :  { %3334 = vmatprep.mubr.bf16.mxu0 %v115_v33  ;;  %3411 = vmatpush3.bf16.msra.mxu0 %v3817_v4 }
  0x5d   :  { %3412 = vmatprep.subr.bf16.mxu0 %v3818_v5 }
  0x60   :  { %3413 = vmatpush3.bf16.msra.mxu0 %v3818_v5 }
  0x61   :  { %3414 = vmatprep.subr.bf16.mxu0 %v3819_v6 }
  0x63   :  { %3335 = vmatmul.mubr.bf16.gmra.mxu0 %v116_v38 }
  0x64   :  { %3338 = vmatprep.mubr.bf16.mxu0 %v117_v39  ;;  %3415 = vmatpush3.bf16.msra.mxu0 %v3819_v6 }
  0x6b   :  { %3339 = vmatmul.mubr.bf16.gmra.mxu0 %v118_v44 }
  0x6c   :  { %3342 = vmatprep.mubr.bf16.mxu0 %v119_v45 }
  0x73   :  { %3343 = vmatmul.mubr.bf16.gmra.mxu0 %v120_v50 }
  0x74   :  { %3346 = vmatprep.mubr.bf16.mxu0 %v121_v51 }
  0x7b   :  { %3347 = vmatmul.mubr.bf16.gmra.mxu0 %v122_v56 }
  0x7c   :  { %3350 = vmatprep.mubr.bf16.mxu0 %v123_v57 }
  0x83   :  { %3351 = vmatmul.mubr.bf16.gmra.mxu0 %v124_v60 }
 0x10b   :  { %v3324_v7 = vpop.f32.mrf.mxu0 }
 0x10c   :  { %v222_v13 = vadd.f32 %v3324_v7, %v4033_v9 }
 0x10d   :  { %v213_v8 = vpop.f32.mrf.mxu0 }
 0x10e   :  { %v214_v11 = vadd.f32 %v4033_v9, %v213_v8  ;;  %v342_v20 = vmax.f32 %v222_v13, 0.0 }
 0x10f   :  { %v3325_v10 = vpop.f32.mrf.mxu0 }
 0x110   :  { %v225_v12 = vadd.f32 %v3325_v10, %v4033_v9  ;;  %v340_v18 = vmax.f32 %v214_v11, 0.0 }
 0x111   :  { %v216_v14 = vpop.f32.mrf.mxu0 }
 0x112   :  { %v217_v15 = vadd.f32 %v4033_v9, %v216_v14  ;;  %v343_v16 = vmax.f32 %v225_v12, 0.0 }
 0x113   :  { %v3328_v17 = vpop.f32.mrf.mxu0 }
 0x114   :  { %v341_v19 = vmax.f32 %v217_v15, 0.0  ;;  %v392_v23 = vpack.c.bf16 %v343_v16, %v342_v20  ;;  %v238_v27 = vadd.f32 %v3328_v17, %v4033_v9 }
 0x115   :  { %v229_v21 = vpop.f32.mrf.mxu0 }
 0x116   :  { %v391_v22 = vpack.c.bf16 %v341_v19, %v340_v18  ;;  %v230_v25 = vadd.f32 %v4033_v9, %v229_v21  ;;  %v346_v34 = vmax.f32 %v238_v27, 0.0 }
 0x117   :  { %v3329_v24 = vpop.f32.mrf.mxu0 }
 0x118   :  { %v241_v26 = vadd.f32 %v3329_v24, %v4033_v9  ;;  %3370 = vmatprep.mubr.bf16.mxu1 %v391_v22  ;;  %v344_v32 = vmax.f32 %v230_v25, 0.0 }
 0x119   :  { %v232_v28 = vpop.f32.mrf.mxu0  ;;  %3371 = vmatmul.mubr.bf16.vlgmr.msra.gmra.mxu1 %v392_v23 }
 0x11a   :  { %v233_v29 = vadd.f32 %v4033_v9, %v232_v28  ;;  %v347_v30 = vmax.f32 %v241_v26, 0.0 }
 0x11b   :  { %v3332_v31 = vpop.f32.mrf.mxu0 }
 0x11c   :  { %v345_v33 = vmax.f32 %v233_v29, 0.0  ;;  %v394_v37 = vpack.c.bf16 %v347_v30, %v346_v34  ;;  %v254_v41 = vadd.f32 %v3332_v31, %v4033_v9 }
 0x11d   :  { %v245_v35 = vpop.f32.mrf.mxu0 }
 0x11e   :  { %v393_v36 = vpack.c.bf16 %v345_v33, %v344_v32  ;;  %v246_v39 = vadd.f32 %v4033_v9, %v245_v35  ;;  %v350_v48 = vmax.f32 %v254_v41, 0.0 }
 0x11f   :  { %v3333_v38 = vpop.f32.mrf.mxu0 }
 0x120   :  { %v257_v40 = vadd.f32 %v3333_v38, %v4033_v9  ;;  %3374 = vmatprep.mubr.bf16.mxu1 %v393_v36  ;;  %v348_v46 = vmax.f32 %v246_v39, 0.0 }
 0x121   :  { %v248_v42 = vpop.f32.mrf.mxu0  ;;  %3375 = vmatmul.mubr.bf16.gmra.mxu1 %v394_v37 }
 0x122   :  { %v249_v43 = vadd.f32 %v4033_v9, %v248_v42  ;;  %v351_v44 = vmax.f32 %v257_v40, 0.0 }
 0x123   :  { %v3336_v45 = vpop.f32.mrf.mxu0 }
 0x124   :  { %v349_v47 = vmax.f32 %v249_v43, 0.0  ;;  %v396_v51 = vpack.c.bf16 %v351_v44, %v350_v48  ;;  %v270_v55 = vadd.f32 %v3336_v45, %v4033_v9 }
 0x125   :  { %v261_v49 = vpop.f32.mrf.mxu0 }
 0x126   :  { %v395_v50 = vpack.c.bf16 %v349_v47, %v348_v46  ;;  %v262_v53 = vadd.f32 %v4033_v9, %v261_v49  ;;  %v354_v62 = vmax.f32 %v270_v55, 0.0 }
 0x127   :  { %v3337_v52 = vpop.f32.mrf.mxu0 }
 0x128   :  { %v273_v54 = vadd.f32 %v3337_v52, %v4033_v9  ;;  %3378 = vmatprep.mubr.bf16.mxu1 %v395_v50  ;;  %v352_v60 = vmax.f32 %v262_v53, 0.0 }
 0x129   :  { %v264_v56 = vpop.f32.mrf.mxu0  ;;  %3379 = vmatmul.mubr.bf16.gmra.mxu1 %v396_v51 }
 0x12a   :  { %v265_v57 = vadd.f32 %v4033_v9, %v264_v56  ;;  %v355_v58 = vmax.f32 %v273_v54, 0.0 }
 0x12b   :  { %v3340_v59 = vpop.f32.mrf.mxu0 }
 0x12c   :  { %v353_v61 = vmax.f32 %v265_v57, 0.0  ;;  %v398_v1 = vpack.c.bf16 %v355_v58, %v354_v62  ;;  %v286_v5 = vadd.f32 %v3340_v59, %v4033_v9  ;;  %v3820_v57 = vld [vmem:[#allocation5 + $0x80] sm:$0xff]   ;;  %v3821_v58 = vld [vmem:[#allocation5 + $0xf8] sm:$0xff]   ;;  %v3822_v59 = vld [vmem:[#allocation5 + $0xf0] sm:$0xff]  }
 0x12d   :  { %v277_v63 = vpop.f32.mrf.mxu0  ;;  %3416 = vmatprep.subr.bf16.mxu0 %v3820_v57  ;;  %3450 = vmatprep.subr.bf16.mxu1 %v3821_v58  ;;  %v3826_v62 = vld [vmem:[#allocation5 + $0xd0] sm:$0xff]  }
 0x12e   :  { %v397_v0 = vpack.c.bf16 %v353_v61, %v352_v60  ;;  %v278_v3 = vadd.f32 %v4033_v9, %v277_v63  ;;  %v358_v13 = vmax.f32 %v286_v5, 0.0  ;;  %3417 = vmatpush3.bf16.msra.mxu0 %v3820_v57  ;;  %3451 = vmatpush3.bf16.msra.mxu1 %v3821_v58  ;;  %v3823_v60 = vld [vmem:[#allocation5 + $0xe8] sm:$0xff]   ;;  %v3825_v61 = vld [vmem:[#allocation5 + $0xd8] sm:$0xff]  }
 0x12f   :  { %v3341_v2 = vpop.f32.mrf.mxu0  ;;  %3452 = vmatprep.subr.bf16.mxu1 %v3822_v59  ;;  %v3827_v63 = vld [vmem:[#allocation5 + $0xc8] sm:$0xff]  }
 0x130   :  { %v289_v4 = vadd.f32 %v3341_v2, %v4033_v9  ;;  %3382 = vmatprep.mubr.bf16.mxu1 %v397_v0  ;;  %v356_v11 = vmax.f32 %v278_v3, 0.0  ;;  %v4067_v2 = vld [vmem:[#allocation7 + $0x1] ss:$0 sm:$0xff] }
 0x131   :  { %v280_v6 = vpop.f32.mrf.mxu0  ;;  %3383 = vmatmul.mubr.bf16.gmra.mxu1 %v398_v1 }
 0x132   :  { %v281_v7 = vadd.f32 %v4033_v9, %v280_v6  ;;  %v359_v8 = vmax.f32 %v289_v4, 0.0  ;;  %3453 = vmatpush3.bf16.msra.mxu1 %v3822_v59 }
 0x133   :  { %v3344_v10 = vpop.f32.mrf.mxu0  ;;  %3454 = vmatprep.subr.bf16.mxu1 %v3823_v60 }
 0x134   :  { %v357_v12 = vmax.f32 %v281_v7, 0.0  ;;  %v400_v16 = vpack.c.bf16 %v359_v8, %v358_v13  ;;  %v302_v20 = vadd.f32 %v3344_v10, %v4033_v9 }
 0x135   :  { %v293_v14 = vpop.f32.mrf.mxu0 }
 0x136   :  { %v399_v15 = vpack.c.bf16 %v357_v12, %v356_v11  ;;  %v294_v18 = vadd.f32 %v4033_v9, %v293_v14  ;;  %v362_v27 = vmax.f32 %v302_v20, 0.0  ;;  %3455 = vmatpush3.bf16.msra.mxu1 %v3823_v60 }
 0x137   :  { %v3345_v17 = vpop.f32.mrf.mxu0 }
 0x138   :  { %v305_v19 = vadd.f32 %v3345_v17, %v4033_v9  ;;  %3386 = vmatprep.mubr.bf16.mxu1 %v399_v15  ;;  %v360_v25 = vmax.f32 %v294_v18, 0.0 }
 0x139   :  { %v296_v21 = vpop.f32.mrf.mxu0  ;;  %3387 = vmatmul.mubr.bf16.gmra.mxu1 %v400_v16 }
 0x13a   :  { %v297_v22 = vadd.f32 %v4033_v9, %v296_v21  ;;  %v363_v23 = vmax.f32 %v305_v19, 0.0 }
 0x13b   :  { %v3348_v24 = vpop.f32.mrf.mxu0 }
 0x13c   :  { %v361_v26 = vmax.f32 %v297_v22, 0.0  ;;  %v402_v30 = vpack.c.bf16 %v363_v23, %v362_v27  ;;  %v318_v34 = vadd.f32 %v3348_v24, %v4033_v9 }
 0x13d   :  { %v309_v28 = vpop.f32.mrf.mxu0 }
 0x13e   :  { %v401_v29 = vpack.c.bf16 %v361_v26, %v360_v25  ;;  %v310_v32 = vadd.f32 %v4033_v9, %v309_v28  ;;  %v366_v41 = vmax.f32 %v318_v34, 0.0 }
 0x13f   :  { %v3349_v31 = vpop.f32.mrf.mxu0 }
 0x140   :  { %v321_v33 = vadd.f32 %v3349_v31, %v4033_v9  ;;  %3390 = vmatprep.mubr.bf16.mxu1 %v401_v29  ;;  %v364_v39 = vmax.f32 %v310_v32, 0.0 }
 0x141   :  { %v312_v35 = vpop.f32.mrf.mxu0  ;;  %3391 = vmatmul.mubr.bf16.gmra.mxu1 %v402_v30 }
 0x142   :  { %v313_v36 = vadd.f32 %v4033_v9, %v312_v35  ;;  %v367_v37 = vmax.f32 %v321_v33, 0.0 }
 0x143   :  { %v3352_v38 = vpop.f32.mrf.mxu0 }
 0x144   :  { %v365_v40 = vmax.f32 %v313_v36, 0.0  ;;  %v404_v44 = vpack.c.bf16 %v367_v37, %v366_v41  ;;  %v334_v48 = vadd.f32 %v3352_v38, %v4033_v9 }
 0x145   :  { %v325_v42 = vpop.f32.mrf.mxu0 }
 0x146   :  { %v403_v43 = vpack.c.bf16 %v365_v40, %v364_v39  ;;  %v326_v46 = vadd.f32 %v4033_v9, %v325_v42  ;;  %v370_v54 = vmax.f32 %v334_v48, 0.0 }
 0x147   :  { %v3353_v45 = vpop.f32.mrf.mxu0 }
 0x148   :  { %v337_v47 = vadd.f32 %v3353_v45, %v4033_v9  ;;  %3394 = vmatprep.mubr.bf16.mxu1 %v403_v43  ;;  %v368_v52 = vmax.f32 %v326_v46, 0.0 }
 0x149   :  { %v328_v49 = vpop.f32.mrf.mxu0  ;;  %3395 = vmatmul.mubr.bf16.gmra.mxu1 %v404_v44 }
 0x14a   :  { %v329_v50 = vadd.f32 %v4033_v9, %v328_v49  ;;  %v371_v51 = vmax.f32 %v337_v47, 0.0  ;;  %v3824_v9 = vld [vmem:[#allocation5 + $0xe0] sm:$0xff]  }
 0x14b   :  { %3456 = vmatprep.subr.bf16.mxu1 %v3824_v9 }
 0x14c   :  { %v369_v53 = vmax.f32 %v329_v50, 0.0  ;;  %v406_v56 = vpack.c.bf16 %v371_v51, %v370_v54  ;;  %3457 = vmatpush3.bf16.msra.mxu1 %v3824_v9 }
 0x14d   :  { %3458 = vmatprep.subr.bf16.mxu1 %v3825_v61 }
 0x14e   :  { %v405_v55 = vpack.c.bf16 %v369_v53, %v368_v52 }
 0x150   :  { %3398 = vmatprep.mubr.bf16.mxu1 %v405_v55  ;;  %3459 = vmatpush3.bf16.msra.mxu1 %v3825_v61 }
 0x151   :  { %3399 = vmatmul.mubr.bf16.gmra.mxu1 %v406_v56  ;;  %3460 = vmatprep.subr.bf16.mxu1 %v3826_v62 }
 0x154   :  { %3461 = vmatpush3.bf16.msra.mxu1 %v3826_v62 }
 0x155   :  { %3462 = vmatprep.subr.bf16.mxu1 %v3827_v63 }
 0x158   :  { %3463 = vmatpush3.bf16.msra.mxu1 %v3827_v63 }
 0x1d9   :  { %v3372_v0 = vpop.f32.mrf.mxu1 }
 0x1da   :  { %v504_v6 = vadd.f32 %v3372_v0, %v4067_v2 }
 0x1db   :  { %v495_v1 = vpop.f32.mrf.mxu1 }
 0x1dc   :  { %v496_v4 = vadd.f32 %v4067_v2, %v495_v1  ;;  %v624_v14 = vmax.f32 %v504_v6, 0.0 }
 0x1dd   :  { %v3373_v3 = vpop.f32.mrf.mxu1 }
 0x1de   :  { %v507_v5 = vadd.f32 %v3373_v3, %v4067_v2  ;;  %v622_v12 = vmax.f32 %v496_v4, 0.0 }
 0x1df   :  { %v498_v7 = vpop.f32.mrf.mxu1 }
 0x1e0   :  { %v499_v8 = vadd.f32 %v4067_v2, %v498_v7  ;;  %v625_v10 = vmax.f32 %v507_v5, 0.0 }
 0x1e1   :  { %v3376_v11 = vpop.f32.mrf.mxu1 }
 0x1e2   :  { %v623_v13 = vmax.f32 %v499_v8, 0.0  ;;  %v674_v17 = vpack.c.bf16 %v625_v10, %v624_v14  ;;  %v520_v21 = vadd.f32 %v3376_v11, %v4067_v2 }
 0x1e3   :  { %v511_v15 = vpop.f32.mrf.mxu1 }
 0x1e4   :  { %v673_v16 = vpack.c.bf16 %v623_v13, %v622_v12  ;;  %v512_v19 = vadd.f32 %v4067_v2, %v511_v15  ;;  %v628_v28 = vmax.f32 %v520_v21, 0.0 }
 0x1e5   :  { %v3377_v18 = vpop.f32.mrf.mxu1 }
 0x1e6   :  { %v523_v20 = vadd.f32 %v3377_v18, %v4067_v2  ;;  %3418 = vmatprep.mubr.bf16.mxu0 %v673_v16  ;;  %v626_v26 = vmax.f32 %v512_v19, 0.0 }
 0x1e7   :  { %v514_v22 = vpop.f32.mrf.mxu1  ;;  %3419 = vmatmul.mubr.bf16.vlgmr.msra.gmra.mxu0 %v674_v17 }
 0x1e8   :  { %v515_v23 = vadd.f32 %v4067_v2, %v514_v22  ;;  %v629_v24 = vmax.f32 %v523_v20, 0.0 }
 0x1e9   :  { %v3380_v25 = vpop.f32.mrf.mxu1 }
 0x1ea   :  { %v627_v27 = vmax.f32 %v515_v23, 0.0  ;;  %v676_v31 = vpack.c.bf16 %v629_v24, %v628_v28  ;;  %v536_v35 = vadd.f32 %v3380_v25, %v4067_v2 }
 0x1eb   :  { %v527_v29 = vpop.f32.mrf.mxu1 }
 0x1ec   :  { %v675_v30 = vpack.c.bf16 %v627_v27, %v626_v26  ;;  %v528_v33 = vadd.f32 %v4067_v2, %v527_v29  ;;  %v632_v42 = vmax.f32 %v536_v35, 0.0 }
 0x1ed   :  { %v3381_v32 = vpop.f32.mrf.mxu1 }
 0x1ee   :  { %v539_v34 = vadd.f32 %v3381_v32, %v4067_v2  ;;  %3422 = vmatprep.mubr.bf16.mxu0 %v675_v30  ;;  %v630_v40 = vmax.f32 %v528_v33, 0.0 }
 0x1ef   :  { %v530_v36 = vpop.f32.mrf.mxu1  ;;  %3423 = vmatmul.mubr.bf16.gmra.mxu0 %v676_v31 }
 0x1f0   :  { %v531_v37 = vadd.f32 %v4067_v2, %v530_v36  ;;  %v633_v38 = vmax.f32 %v539_v34, 0.0 }
 0x1f1   :  { %v3384_v39 = vpop.f32.mrf.mxu1 }
 0x1f2   :  { %v631_v41 = vmax.f32 %v531_v37, 0.0  ;;  %v678_v45 = vpack.c.bf16 %v633_v38, %v632_v42  ;;  %v552_v49 = vadd.f32 %v3384_v39, %v4067_v2 }
 0x1f3   :  { %v543_v43 = vpop.f32.mrf.mxu1 }
 0x1f4   :  { %v677_v44 = vpack.c.bf16 %v631_v41, %v630_v40  ;;  %v544_v47 = vadd.f32 %v4067_v2, %v543_v43  ;;  %v636_v56 = vmax.f32 %v552_v49, 0.0 }
 0x1f5   :  { %v3385_v46 = vpop.f32.mrf.mxu1 }
 0x1f6   :  { %v555_v48 = vadd.f32 %v3385_v46, %v4067_v2  ;;  %3426 = vmatprep.mubr.bf16.mxu0 %v677_v44  ;;  %v634_v54 = vmax.f32 %v544_v47, 0.0 }
 0x1f7   :  { %v546_v50 = vpop.f32.mrf.mxu1  ;;  %3427 = vmatmul.mubr.bf16.gmra.mxu0 %v678_v45 }
 0x1f8   :  { %v547_v51 = vadd.f32 %v4067_v2, %v546_v50  ;;  %v637_v52 = vmax.f32 %v555_v48, 0.0 }
 0x1f9   :  { %v3388_v53 = vpop.f32.mrf.mxu1 }
 0x1fa   :  { %v635_v55 = vmax.f32 %v547_v51, 0.0  ;;  %v680_v59 = vpack.c.bf16 %v637_v52, %v636_v56  ;;  %v568_v62 = vadd.f32 %v3388_v53, %v4067_v2  ;;  %v3828_v51 = vld [vmem:[#allocation5 + $0xc0] sm:$0xff]   ;;  %v3829_v52 = vld [vmem:[#allocation5 + $0x138] sm:$0xff]   ;;  %v3830_v53 = vld [vmem:[#allocation5 + $0x130] sm:$0xff]  }
 0x1fb   :  { %v559_v57 = vpop.f32.mrf.mxu1  ;;  %3464 = vmatprep.subr.bf16.mxu1 %v3828_v51  ;;  %3498 = vmatprep.subr.bf16.mxu0 %v3829_v52  ;;  %v3834_v56 = vld [vmem:[#allocation5 + $0x110] sm:$0xff]  }
 0x1fc   :  { %v679_v58 = vpack.c.bf16 %v635_v55, %v634_v54  ;;  %v560_v9 = vadd.f32 %v4067_v2, %v559_v57  ;;  %v640_v6 = vmax.f32 %v568_v62, 0.0  ;;  %3465 = vmatpush3.bf16.msra.mxu1 %v3828_v51  ;;  %3499 = vmatpush3.bf16.msra.mxu0 %v3829_v52  ;;  %v3831_v54 = vld [vmem:[#allocation5 + $0x128] sm:$0xff]   ;;  %v3833_v55 = vld [vmem:[#allocation5 + $0x118] sm:$0xff]  }
 0x1fd   :  { %v3389_v60 = vpop.f32.mrf.mxu1  ;;  %3500 = vmatprep.subr.bf16.mxu0 %v3830_v53  ;;  %v3835_v57 = vld [vmem:[#allocation5 + $0x108] sm:$0xff]  }
 0x1fe   :  { %v571_v61 = vadd.f32 %v3389_v60, %v4067_v2  ;;  %3430 = vmatprep.mubr.bf16.mxu0 %v679_v58  ;;  %v638_v4 = vmax.f32 %v560_v9, 0.0  ;;  %v4101_v60 = vld [vmem:[#allocation7 + $0x2] ss:$0 sm:$0xff] }
 0x1ff   :  { %v562_v63 = vpop.f32.mrf.mxu1  ;;  %3431 = vmatmul.mubr.bf16.gmra.mxu0 %v680_v59 }
 0x200   :  { %v563_v0 = vadd.f32 %v4067_v2, %v562_v63  ;;  %v641_v1 = vmax.f32 %v571_v61, 0.0  ;;  %3501 = vmatpush3.bf16.msra.mxu0 %v3830_v53 }
 0x201   :  { %v3392_v3 = vpop.f32.mrf.mxu1  ;;  %3502 = vmatprep.subr.bf16.mxu0 %v3831_v54 }
 0x202   :  { %v639_v5 = vmax.f32 %v563_v0, 0.0  ;;  %v682_v10 = vpack.c.bf16 %v641_v1, %v640_v6  ;;  %v584_v14 = vadd.f32 %v3392_v3, %v4067_v2 }
 0x203   :  { %v575_v7 = vpop.f32.mrf.mxu1 }
 0x204   :  { %v681_v8 = vpack.c.bf16 %v639_v5, %v638_v4  ;;  %v576_v12 = vadd.f32 %v4067_v2, %v575_v7  ;;  %v644_v21 = vmax.f32 %v584_v14, 0.0  ;;  %3503 = vmatpush3.bf16.msra.mxu0 %v3831_v54 }
 0x205   :  { %v3393_v11 = vpop.f32.mrf.mxu1 }
 0x206   :  { %v587_v13 = vadd.f32 %v3393_v11, %v4067_v2  ;;  %3434 = vmatprep.mubr.bf16.mxu0 %v681_v8  ;;  %v642_v19 = vmax.f32 %v576_v12, 0.0 }
 0x207   :  { %v578_v15 = vpop.f32.mrf.mxu1  ;;  %3435 = vmatmul.mubr.bf16.gmra.mxu0 %v682_v10 }
 0x208   :  { %v579_v16 = vadd.f32 %v4067_v2, %v578_v15  ;;  %v645_v17 = vmax.f32 %v587_v13, 0.0 }
 0x209   :  { %v3396_v18 = vpop.f32.mrf.mxu1 }
 0x20a   :  { %v643_v20 = vmax.f32 %v579_v16, 0.0  ;;  %v684_v24 = vpack.c.bf16 %v645_v17, %v644_v21  ;;  %v600_v28 = vadd.f32 %v3396_v18, %v4067_v2 }
 0x20b   :  { %v591_v22 = vpop.f32.mrf.mxu1 }
 0x20c   :  { %v683_v23 = vpack.c.bf16 %v643_v20, %v642_v19  ;;  %v592_v26 = vadd.f32 %v4067_v2, %v591_v22  ;;  %v648_v35 = vmax.f32 %v600_v28, 0.0 }
 0x20d   :  { %v3397_v25 = vpop.f32.mrf.mxu1 }
 0x20e   :  { %v603_v27 = vadd.f32 %v3397_v25, %v4067_v2  ;;  %3438 = vmatprep.mubr.bf16.mxu0 %v683_v23  ;;  %v646_v33 = vmax.f32 %v592_v26, 0.0 }
 0x20f   :  { %v594_v29 = vpop.f32.mrf.mxu1  ;;  %3439 = vmatmul.mubr.bf16.gmra.mxu0 %v684_v24 }
 0x210   :  { %v595_v30 = vadd.f32 %v4067_v2, %v594_v29  ;;  %v649_v31 = vmax.f32 %v603_v27, 0.0 }
 0x211   :  { %v3400_v32 = vpop.f32.mrf.mxu1 }
 0x212   :  { %v647_v34 = vmax.f32 %v595_v30, 0.0  ;;  %v686_v38 = vpack.c.bf16 %v649_v31, %v648_v35  ;;  %v616_v42 = vadd.f32 %v3400_v32, %v4067_v2 }
 0x213   :  { %v607_v36 = vpop.f32.mrf.mxu1 }
 0x214   :  { %v685_v37 = vpack.c.bf16 %v647_v34, %v646_v33  ;;  %v608_v40 = vadd.f32 %v4067_v2, %v607_v36  ;;  %v652_v48 = vmax.f32 %v616_v42, 0.0 }
 0x215   :  { %v3401_v39 = vpop.f32.mrf.mxu1 }
 0x216   :  { %v619_v41 = vadd.f32 %v3401_v39, %v4067_v2  ;;  %3442 = vmatprep.mubr.bf16.mxu0 %v685_v37  ;;  %v650_v46 = vmax.f32 %v608_v40, 0.0 }
 0x217   :  { %v610_v43 = vpop.f32.mrf.mxu1  ;;  %3443 = vmatmul.mubr.bf16.gmra.mxu0 %v686_v38 }
 0x218   :  { %v611_v44 = vadd.f32 %v4067_v2, %v610_v43  ;;  %v653_v45 = vmax.f32 %v619_v41, 0.0  ;;  %v3832_v2 = vld [vmem:[#allocation5 + $0x120] sm:$0xff]  }
 0x219   :  { %3504 = vmatprep.subr.bf16.mxu0 %v3832_v2 }
 0x21a   :  { %v651_v47 = vmax.f32 %v611_v44, 0.0  ;;  %v688_v50 = vpack.c.bf16 %v653_v45, %v652_v48  ;;  %3505 = vmatpush3.bf16.msra.mxu0 %v3832_v2 }
 0x21b   :  { %3506 = vmatprep.subr.bf16.mxu0 %v3833_v55 }
 0x21c   :  { %v687_v49 = vpack.c.bf16 %v651_v47, %v650_v46 }
 0x21e   :  { %3446 = vmatprep.mubr.bf16.mxu0 %v687_v49  ;;  %3507 = vmatpush3.bf16.msra.mxu0 %v3833_v55 }
 0x21f   :  { %3447 = vmatmul.mubr.bf16.gmra.mxu0 %v688_v50  ;;  %3508 = vmatprep.subr.bf16.mxu0 %v3834_v56 }
 0x222   :  { %3509 = vmatpush3.bf16.msra.mxu0 %v3834_v56 }
 0x223   :  { %3510 = vmatprep.subr.bf16.mxu0 %v3835_v57 }
 0x226   :  { %3511 = vmatpush3.bf16.msra.mxu0 %v3835_v57 }
 0x2a7   :  { %v3420_v58 = vpop.f32.mrf.mxu0 }
 0x2a8   :  { %v786_v63 = vadd.f32 %v3420_v58, %v4101_v60 }
 0x2a9   :  { %v777_v59 = vpop.f32.mrf.mxu0 }
 0x2aa   :  { %v778_v61 = vadd.f32 %v4101_v60, %v777_v59  ;;  %v906_v7 = vmax.f32 %v786_v63, 0.0 }
 0x2ab   :  { %v3421_v9 = vpop.f32.mrf.mxu0 }
 0x2ac   :  { %v789_v62 = vadd.f32 %v3421_v9, %v4101_v60  ;;  %v904_v5 = vmax.f32 %v778_v61, 0.0 }
 0x2ad   :  { %v780_v0 = vpop.f32.mrf.mxu0 }
 0x2ae   :  { %v781_v1 = vadd.f32 %v4101_v60, %v780_v0  ;;  %v907_v3 = vmax.f32 %v789_v62, 0.0 }
 0x2af   :  { %v3424_v4 = vpop.f32.mrf.mxu0 }
 0x2b0   :  { %v905_v6 = vmax.f32 %v781_v1, 0.0  ;;  %v956_v11 = vpack.c.bf16 %v907_v3, %v906_v7  ;;  %v802_v15 = vadd.f32 %v3424_v4, %v4101_v60 }
 0x2b1   :  { %v793_v8 = vpop.f32.mrf.mxu0 }
 0x2b2   :  { %v955_v10 = vpack.c.bf16 %v905_v6, %v904_v5  ;;  %v794_v13 = vadd.f32 %v4101_v60, %v793_v8  ;;  %v910_v22 = vmax.f32 %v802_v15, 0.0 }
 0x2b3   :  { %v3425_v12 = vpop.f32.mrf.mxu0 }
 0x2b4   :  { %v805_v14 = vadd.f32 %v3425_v12, %v4101_v60  ;;  %3466 = vmatprep.mubr.bf16.mxu1 %v955_v10  ;;  %v908_v20 = vmax.f32 %v794_v13, 0.0 }
 0x2b5   :  { %v796_v16 = vpop.f32.mrf.mxu0  ;;  %3467 = vmatmul.mubr.bf16.vlgmr.msra.gmra.mxu1 %v956_v11 }
 0x2b6   :  { %v797_v17 = vadd.f32 %v4101_v60, %v796_v16  ;;  %v911_v18 = vmax.f32 %v805_v14, 0.0 }
 0x2b7   :  { %v3428_v19 = vpop.f32.mrf.mxu0 }
 0x2b8   :  { %v909_v21 = vmax.f32 %v797_v17, 0.0  ;;  %v958_v25 = vpack.c.bf16 %v911_v18, %v910_v22  ;;  %v818_v29 = vadd.f32 %v3428_v19, %v4101_v60 }
 0x2b9   :  { %v809_v23 = vpop.f32.mrf.mxu0 }
 0x2ba   :  { %v957_v24 = vpack.c.bf16 %v909_v21, %v908_v20  ;;  %v810_v27 = vadd.f32 %v4101_v60, %v809_v23  ;;  %v914_v36 = vmax.f32 %v818_v29, 0.0 }
 0x2bb   :  { %v3429_v26 = vpop.f32.mrf.mxu0 }
 0x2bc   :  { %v821_v28 = vadd.f32 %v3429_v26, %v4101_v60  ;;  %3470 = vmatprep.mubr.bf16.mxu1 %v957_v24  ;;  %v912_v34 = vmax.f32 %v810_v27, 0.0 }
 0x2bd   :  { %v812_v30 = vpop.f32.mrf.mxu0  ;;  %3471 = vmatmul.mubr.bf16.gmra.mxu1 %v958_v25 }
 0x2be   :  { %v813_v31 = vadd.f32 %v4101_v60, %v812_v30  ;;  %v915_v32 = vmax.f32 %v821_v28, 0.0 }
 0x2bf   :  { %v3432_v33 = vpop.f32.mrf.mxu0 }
 0x2c0   :  { %v913_v35 = vmax.f32 %v813_v31, 0.0  ;;  %v960_v39 = vpack.c.bf16 %v915_v32, %v914_v36  ;;  %v834_v43 = vadd.f32 %v3432_v33, %v4101_v60 }
 0x2c1   :  { %v825_v37 = vpop.f32.mrf.mxu0 }
 0x2c2   :  { %v959_v38 = vpack.c.bf16 %v913_v35, %v912_v34  ;;  %v826_v41 = vadd.f32 %v4101_v60, %v825_v37  ;;  %v918_v50 = vmax.f32 %v834_v43, 0.0 }
 0x2c3   :  { %v3433_v40 = vpop.f32.mrf.mxu0 }
 0x2c4   :  { %v837_v42 = vadd.f32 %v3433_v40, %v4101_v60  ;;  %3474 = vmatprep.mubr.bf16.mxu1 %v959_v38  ;;  %v916_v48 = vmax.f32 %v826_v41, 0.0 }
 0x2c5   :  { %v828_v44 = vpop.f32.mrf.mxu0  ;;  %3475 = vmatmul.mubr.bf16.gmra.mxu1 %v960_v39 }
 0x2c6   :  { %v829_v45 = vadd.f32 %v4101_v60, %v828_v44  ;;  %v919_v46 = vmax.f32 %v837_v42, 0.0 }
 0x2c7   :  { %v3436_v47 = vpop.f32.mrf.mxu0 }
 0x2c8   :  { %v917_v49 = vmax.f32 %v829_v45, 0.0  ;;  %v962_v53 = vpack.c.bf16 %v919_v46, %v918_v50  ;;  %v850_v56 = vadd.f32 %v3436_v47, %v4101_v60  ;;  %v3836_v45 = vld [vmem:[#allocation5 + $0x100] sm:$0xff]   ;;  %v3837_v46 = vld [vmem:[#allocation5 + $0x178] sm:$0xff]   ;;  %v3838_v47 = vld [vmem:[#allocation5 + $0x170] sm:$0xff]  }
 0x2c9   :  { %v841_v51 = vpop.f32.mrf.mxu0  ;;  %3512 = vmatprep.subr.bf16.mxu0 %v3836_v45  ;;  %3546 = vmatprep.subr.bf16.mxu1 %v3837_v46  ;;  %v3842_v50 = vld [vmem:[#allocation5 + $0x150] sm:$0xff]  }
 0x2ca   :  { %v961_v52 = vpack.c.bf16 %v917_v49, %v916_v48  ;;  %v842_v2 = vadd.f32 %v4101_v60, %v841_v51  ;;  %v922_v63 = vmax.f32 %v850_v56, 0.0  ;;  %3513 = vmatpush3.bf16.msra.mxu0 %v3836_v45  ;;  %3547 = vmatpush3.bf16.msra.mxu1 %v3837_v46  ;;  %v3839_v48 = vld [vmem:[#allocation5 + $0x168] sm:$0xff]   ;;  %v3841_v49 = vld [vmem:[#allocation5 + $0x158] sm:$0xff]  }
 0x2cb   :  { %v3437_v54 = vpop.f32.mrf.mxu0  ;;  %3548 = vmatprep.subr.bf16.mxu1 %v3838_v47  ;;  %v3843_v51 = vld [vmem:[#allocation5 + $0x148] sm:$0xff]  }
 0x2cc   :  { %v853_v55 = vadd.f32 %v3437_v54, %v4101_v60  ;;  %3478 = vmatprep.mubr.bf16.mxu1 %v961_v52  ;;  %v920_v61 = vmax.f32 %v842_v2, 0.0  ;;  %v4135_v54 = vld [vmem:[#allocation7 + $0x3] ss:$0 sm:$0xff] }
 0x2cd   :  { %v844_v57 = vpop.f32.mrf.mxu0  ;;  %3479 = vmatmul.mubr.bf16.gmra.mxu1 %v962_v53 }
 0x2ce   :  { %v845_v58 = vadd.f32 %v4101_v60, %v844_v57  ;;  %v923_v59 = vmax.f32 %v853_v55, 0.0  ;;  %3549 = vmatpush3.bf16.msra.mxu1 %v3838_v47 }
 0x2cf   :  { %v3440_v9 = vpop.f32.mrf.mxu0  ;;  %3550 = vmatprep.subr.bf16.mxu1 %v3839_v48 }
 0x2d0   :  { %v921_v62 = vmax.f32 %v845_v58, 0.0  ;;  %v964_v3 = vpack.c.bf16 %v923_v59, %v922_v63  ;;  %v866_v7 = vadd.f32 %v3440_v9, %v4101_v60 }
 0x2d1   :  { %v857_v0 = vpop.f32.mrf.mxu0 }
 0x2d2   :  { %v963_v1 = vpack.c.bf16 %v921_v62, %v920_v61  ;;  %v858_v5 = vadd.f32 %v4101_v60, %v857_v0  ;;  %v926_v15 = vmax.f32 %v866_v7, 0.0  ;;  %3551 = vmatpush3.bf16.msra.mxu1 %v3839_v48 }
 0x2d3   :  { %v3441_v4 = vpop.f32.mrf.mxu0 }
 0x2d4   :  { %v869_v6 = vadd.f32 %v3441_v4, %v4101_v60  ;;  %3482 = vmatprep.mubr.bf16.mxu1 %v963_v1  ;;  %v924_v13 = vmax.f32 %v858_v5, 0.0 }
 0x2d5   :  { %v860_v8 = vpop.f32.mrf.mxu0  ;;  %3483 = vmatmul.mubr.bf16.gmra.mxu1 %v964_v3 }
 0x2d6   :  { %v861_v10 = vadd.f32 %v4101_v60, %v860_v8  ;;  %v927_v11 = vmax.f32 %v869_v6, 0.0 }
 0x2d7   :  { %v3444_v12 = vpop.f32.mrf.mxu0 }
 0x2d8   :  { %v925_v14 = vmax.f32 %v861_v10, 0.0  ;;  %v966_v18 = vpack.c.bf16 %v927_v11, %v926_v15  ;;  %v882_v22 = vadd.f32 %v3444_v12, %v4101_v60 }
 0x2d9   :  { %v873_v16 = vpop.f32.mrf.mxu0 }
 0x2da   :  { %v965_v17 = vpack.c.bf16 %v925_v14, %v924_v13  ;;  %v874_v20 = vadd.f32 %v4101_v60, %v873_v16  ;;  %v930_v29 = vmax.f32 %v882_v22, 0.0 }
 0x2db   :  { %v3445_v19 = vpop.f32.mrf.mxu0 }
 0x2dc   :  { %v885_v21 = vadd.f32 %v3445_v19, %v4101_v60  ;;  %3486 = vmatprep.mubr.bf16.mxu1 %v965_v17  ;;  %v928_v27 = vmax.f32 %v874_v20, 0.0 }
 0x2dd   :  { %v876_v23 = vpop.f32.mrf.mxu0  ;;  %3487 = vmatmul.mubr.bf16.gmra.mxu1 %v966_v18 }
 0x2de   :  { %v877_v24 = vadd.f32 %v4101_v60, %v876_v23  ;;  %v931_v25 = vmax.f32 %v885_v21, 0.0 }
 0x2df   :  { %v3448_v26 = vpop.f32.mrf.mxu0 }
 0x2e0   :  { %v929_v28 = vmax.f32 %v877_v24, 0.0  ;;  %v968_v32 = vpack.c.bf16 %v931_v25, %v930_v29  ;;  %v898_v36 = vadd.f32 %v3448_v26, %v4101_v60 }
 0x2e1   :  { %v889_v30 = vpop.f32.mrf.mxu0 }
 0x2e2   :  { %v967_v31 = vpack.c.bf16 %v929_v28, %v928_v27  ;;  %v890_v34 = vadd.f32 %v4101_v60, %v889_v30  ;;  %v934_v42 = vmax.f32 %v898_v36, 0.0 }
 0x2e3   :  { %v3449_v33 = vpop.f32.mrf.mxu0 }
 0x2e4   :  { %v901_v35 = vadd.f32 %v3449_v33, %v4101_v60  ;;  %3490 = vmatprep.mubr.bf16.mxu1 %v967_v31  ;;  %v932_v40 = vmax.f32 %v890_v34, 0.0 }
 0x2e5   :  { %v892_v37 = vpop.f32.mrf.mxu0  ;;  %3491 = vmatmul.mubr.bf16.gmra.mxu1 %v968_v32 }
 0x2e6   :  { %v893_v38 = vadd.f32 %v4101_v60, %v892_v37  ;;  %v935_v39 = vmax.f32 %v901_v35, 0.0  ;;  %v3840_v60 = vld [vmem:[#allocation5 + $0x160] sm:$0xff]  }
 0x2e7   :  { %3552 = vmatprep.subr.bf16.mxu1 %v3840_v60 }
 0x2e8   :  { %v933_v41 = vmax.f32 %v893_v38, 0.0  ;;  %v970_v44 = vpack.c.bf16 %v935_v39, %v934_v42  ;;  %3553 = vmatpush3.bf16.msra.mxu1 %v3840_v60 }
 0x2e9   :  { %3554 = vmatprep.subr.bf16.mxu1 %v3841_v49 }
 0x2ea   :  { %v969_v43 = vpack.c.bf16 %v933_v41, %v932_v40 }
 0x2ec   :  { %3494 = vmatprep.mubr.bf16.mxu1 %v969_v43  ;;  %3555 = vmatpush3.bf16.msra.mxu1 %v3841_v49 }
 0x2ed   :  { %3495 = vmatmul.mubr.bf16.gmra.mxu1 %v970_v44  ;;  %3556 = vmatprep.subr.bf16.mxu1 %v3842_v50 }
 0x2f0   :  { %3557 = vmatpush3.bf16.msra.mxu1 %v3842_v50 }
 0x2f1   :  { %3558 = vmatprep.subr.bf16.mxu1 %v3843_v51 }
 0x2f4   :  { %3559 = vmatpush3.bf16.msra.mxu1 %v3843_v51 }
 0x375   :  { %v3468_v52 = vpop.f32.mrf.mxu1 }
 0x376   :  { %v1068_v57 = vadd.f32 %v3468_v52, %v4135_v54 }
 0x377   :  { %v1059_v53 = vpop.f32.mrf.mxu1 }
 0x378   :  { %v1060_v55 = vadd.f32 %v4135_v54, %v1059_v53  ;;  %v1188_v0 = vmax.f32 %v1068_v57, 0.0 }
 0x379   :  { %v3469_v2 = vpop.f32.mrf.mxu1 }
 0x37a   :  { %v1071_v56 = vadd.f32 %v3469_v2, %v4135_v54  ;;  %v1186_v62 = vmax.f32 %v1060_v55, 0.0 }
 0x37b   :  { %v1062_v58 = vpop.f32.mrf.mxu1 }
 0x37c   :  { %v1063_v59 = vadd.f32 %v4135_v54, %v1062_v58  ;;  %v1189_v9 = vmax.f32 %v1071_v56, 0.0 }
 0x37d   :  { %v3472_v61 = vpop.f32.mrf.mxu1 }
 0x37e   :  { %v1187_v63 = vmax.f32 %v1063_v59, 0.0  ;;  %v1238_v4 = vpack.c.bf16 %v1189_v9, %v1188_v0  ;;  %v1084_v8 = vadd.f32 %v3472_v61, %v4135_v54 }
 0x37f   :  { %v1075_v1 = vpop.f32.mrf.mxu1 }
 0x380   :  { %v1237_v3 = vpack.c.bf16 %v1187_v63, %v1186_v62  ;;  %v1076_v6 = vadd.f32 %v4135_v54, %v1075_v1  ;;  %v1192_v16 = vmax.f32 %v1084_v8, 0.0 }
 0x381   :  { %v3473_v5 = vpop.f32.mrf.mxu1 }
 0x382   :  { %v1087_v7 = vadd.f32 %v3473_v5, %v4135_v54  ;;  %3514 = vmatprep.mubr.bf16.mxu0 %v1237_v3  ;;  %v1190_v14 = vmax.f32 %v1076_v6, 0.0 }
 0x383   :  { %v1078_v10 = vpop.f32.mrf.mxu1  ;;  %3515 = vmatmul.mubr.bf16.vlgmr.msra.gmra.mxu0 %v1238_v4 }
 0x384   :  { %v1079_v11 = vadd.f32 %v4135_v54, %v1078_v10  ;;  %v1193_v12 = vmax.f32 %v1087_v7, 0.0 }
 0x385   :  { %v3476_v13 = vpop.f32.mrf.mxu1 }
 0x386   :  { %v1191_v15 = vmax.f32 %v1079_v11, 0.0  ;;  %v1240_v19 = vpack.c.bf16 %v1193_v12, %v1192_v16  ;;  %v1100_v23 = vadd.f32 %v3476_v13, %v4135_v54 }
 0x387   :  { %v1091_v17 = vpop.f32.mrf.mxu1 }
 0x388   :  { %v1239_v18 = vpack.c.bf16 %v1191_v15, %v1190_v14  ;;  %v1092_v21 = vadd.f32 %v4135_v54, %v1091_v17  ;;  %v1196_v30 = vmax.f32 %v1100_v23, 0.0 }
 0x389   :  { %v3477_v20 = vpop.f32.mrf.mxu1 }
 0x38a   :  { %v1103_v22 = vadd.f32 %v3477_v20, %v4135_v54  ;;  %3518 = vmatprep.mubr.bf16.mxu0 %v1239_v18  ;;  %v1194_v28 = vmax.f32 %v1092_v21, 0.0 }
 0x38b   :  { %v1094_v24 = vpop.f32.mrf.mxu1  ;;  %3519 = vmatmul.mubr.bf16.gmra.mxu0 %v1240_v19 }
 0x38c   :  { %v1095_v25 = vadd.f32 %v4135_v54, %v1094_v24  ;;  %v1197_v26 = vmax.f32 %v1103_v22, 0.0 }
 0x38d   :  { %v3480_v27 = vpop.f32.mrf.mxu1 }
 0x38e   :  { %v1195_v29 = vmax.f32 %v1095_v25, 0.0  ;;  %v1242_v33 = vpack.c.bf16 %v1197_v26, %v1196_v30  ;;  %v1116_v37 = vadd.f32 %v3480_v27, %v4135_v54 }
 0x38f   :  { %v1107_v31 = vpop.f32.mrf.mxu1 }
 0x390   :  { %v1241_v32 = vpack.c.bf16 %v1195_v29, %v1194_v28  ;;  %v1108_v35 = vadd.f32 %v4135_v54, %v1107_v31  ;;  %v1200_v44 = vmax.f32 %v1116_v37, 0.0 }
 0x391   :  { %v3481_v34 = vpop.f32.mrf.mxu1 }
 0x392   :  { %v1119_v36 = vadd.f32 %v3481_v34, %v4135_v54  ;;  %3522 = vmatprep.mubr.bf16.mxu0 %v1241_v32  ;;  %v1198_v42 = vmax.f32 %v1108_v35, 0.0 }
 0x393   :  { %v1110_v38 = vpop.f32.mrf.mxu1  ;;  %3523 = vmatmul.mubr.bf16.gmra.mxu0 %v1242_v33 }
 0x394   :  { %v1111_v39 = vadd.f32 %v4135_v54, %v1110_v38  ;;  %v1201_v40 = vmax.f32 %v1119_v36, 0.0 }
 0x395   :  { %v3484_v41 = vpop.f32.mrf.mxu1 }
 0x396   :  { %v1199_v43 = vmax.f32 %v1111_v39, 0.0  ;;  %v1244_v47 = vpack.c.bf16 %v1201_v40, %v1200_v44  ;;  %v1132_v50 = vadd.f32 %v3484_v41, %v4135_v54  ;;  %v3844_v39 = vld [vmem:[#allocation5 + $0x140] sm:$0xff]   ;;  %v3845_v40 = vld [vmem:[#allocation5 + $0x1b8] sm:$0xff]   ;;  %v3846_v41 = vld [vmem:[#allocation5 + $0x1b0] sm:$0xff]  }
 0x397   :  { %v1123_v45 = vpop.f32.mrf.mxu1  ;;  %3560 = vmatprep.subr.bf16.mxu1 %v3844_v39  ;;  %3594 = vmatprep.subr.bf16.mxu0 %v3845_v40  ;;  %v3850_v44 = vld [vmem:[#allocation5 + $0x190] sm:$0xff]  }
 0x398   :  { %v1243_v46 = vpack.c.bf16 %v1199_v43, %v1198_v42  ;;  %v1124_v60 = vadd.f32 %v4135_v54, %v1123_v45  ;;  %v1204_v57 = vmax.f32 %v1132_v50, 0.0  ;;  %3561 = vmatpush3.bf16.msra.mxu1 %v3844_v39  ;;  %3595 = vmatpush3.bf16.msra.mxu0 %v3845_v40  ;;  %v3847_v42 = vld [vmem:[#allocation5 + $0x1a8] sm:$0xff]   ;;  %v3849_v43 = vld [vmem:[#allocation5 + $0x198] sm:$0xff]  }
 0x399   :  { %v3485_v48 = vpop.f32.mrf.mxu1  ;;  %3596 = vmatprep.subr.bf16.mxu0 %v3846_v41  ;;  %v3851_v45 = vld [vmem:[#allocation5 + $0x188] sm:$0xff]  }
 0x39a   :  { %v1135_v49 = vadd.f32 %v3485_v48, %v4135_v54  ;;  %3526 = vmatprep.mubr.bf16.mxu0 %v1243_v46  ;;  %v1202_v55 = vmax.f32 %v1124_v60, 0.0  ;;  %v4169_v46 = vld [vmem:[#allocation7 + $0x4] ss:$0 sm:$0xff] }
 0x39b   :  { %v1126_v51 = vpop.f32.mrf.mxu1  ;;  %3527 = vmatmul.mubr.bf16.gmra.mxu0 %v1244_v47 }
 0x39c   :  { %v1127_v52 = vadd.f32 %v4135_v54, %v1126_v51  ;;  %v1205_v53 = vmax.f32 %v1135_v49, 0.0  ;;  %3597 = vmatpush3.bf16.msra.mxu0 %v3846_v41 }
 0x39d   :  { %v3488_v2 = vpop.f32.mrf.mxu1  ;;  %3598 = vmatprep.subr.bf16.mxu0 %v3847_v42 }
 0x39e   :  { %v1203_v56 = vmax.f32 %v1127_v52, 0.0  ;;  %v1246_v9 = vpack.c.bf16 %v1205_v53, %v1204_v57  ;;  %v1148_v0 = vadd.f32 %v3488_v2, %v4135_v54 }
 0x39f   :  { %v1139_v58 = vpop.f32.mrf.mxu1 }
 0x3a0   :  { %v1245_v59 = vpack.c.bf16 %v1203_v56, %v1202_v55  ;;  %v1140_v62 = vadd.f32 %v4135_v54, %v1139_v58  ;;  %v1208_v8 = vmax.f32 %v1148_v0, 0.0  ;;  %3599 = vmatpush3.bf16.msra.mxu0 %v3847_v42 }
 0x3a1   :  { %v3489_v61 = vpop.f32.mrf.mxu1 }
 0x3a2   :  { %v1151_v63 = vadd.f32 %v3489_v61, %v4135_v54  ;;  %3530 = vmatprep.mubr.bf16.mxu0 %v1245_v59  ;;  %v1206_v6 = vmax.f32 %v1140_v62, 0.0 }
 0x3a3   :  { %v1142_v1 = vpop.f32.mrf.mxu1  ;;  %3531 = vmatmul.mubr.bf16.gmra.mxu0 %v1246_v9 }
 0x3a4   :  { %v1143_v3 = vadd.f32 %v4135_v54, %v1142_v1  ;;  %v1209_v4 = vmax.f32 %v1151_v63, 0.0 }
 0x3a5   :  { %v3492_v5 = vpop.f32.mrf.mxu1 }
 0x3a6   :  { %v1207_v7 = vmax.f32 %v1143_v3, 0.0  ;;  %v1248_v12 = vpack.c.bf16 %v1209_v4, %v1208_v8  ;;  %v1164_v16 = vadd.f32 %v3492_v5, %v4135_v54 }
 0x3a7   :  { %v1155_v10 = vpop.f32.mrf.mxu1 }
 0x3a8   :  { %v1247_v11 = vpack.c.bf16 %v1207_v7, %v1206_v6  ;;  %v1156_v14 = vadd.f32 %v4135_v54, %v1155_v10  ;;  %v1212_v23 = vmax.f32 %v1164_v16, 0.0 }
 0x3a9   :  { %v3493_v13 = vpop.f32.mrf.mxu1 }
 0x3aa   :  { %v1167_v15 = vadd.f32 %v3493_v13, %v4135_v54  ;;  %3534 = vmatprep.mubr.bf16.mxu0 %v1247_v11  ;;  %v1210_v21 = vmax.f32 %v1156_v14, 0.0 }
 0x3ab   :  { %v1158_v17 = vpop.f32.mrf.mxu1  ;;  %3535 = vmatmul.mubr.bf16.gmra.mxu0 %v1248_v12 }
 0x3ac   :  { %v1159_v18 = vadd.f32 %v4135_v54, %v1158_v17  ;;  %v1213_v19 = vmax.f32 %v1167_v15, 0.0 }
 0x3ad   :  { %v3496_v20 = vpop.f32.mrf.mxu1 }
 0x3ae   :  { %v1211_v22 = vmax.f32 %v1159_v18, 0.0  ;;  %v1250_v26 = vpack.c.bf16 %v1213_v19, %v1212_v23  ;;  %v1180_v30 = vadd.f32 %v3496_v20, %v4135_v54 }
 0x3af   :  { %v1171_v24 = vpop.f32.mrf.mxu1 }
 0x3b0   :  { %v1249_v25 = vpack.c.bf16 %v1211_v22, %v1210_v21  ;;  %v1172_v28 = vadd.f32 %v4135_v54, %v1171_v24  ;;  %v1216_v36 = vmax.f32 %v1180_v30, 0.0 }
 0x3b1   :  { %v3497_v27 = vpop.f32.mrf.mxu1 }
 0x3b2   :  { %v1183_v29 = vadd.f32 %v3497_v27, %v4135_v54  ;;  %3538 = vmatprep.mubr.bf16.mxu0 %v1249_v25  ;;  %v1214_v34 = vmax.f32 %v1172_v28, 0.0 }
 0x3b3   :  { %v1174_v31 = vpop.f32.mrf.mxu1  ;;  %3539 = vmatmul.mubr.bf16.gmra.mxu0 %v1250_v26 }
 0x3b4   :  { %v1175_v32 = vadd.f32 %v4135_v54, %v1174_v31  ;;  %v1217_v33 = vmax.f32 %v1183_v29, 0.0  ;;  %v3848_v54 = vld [vmem:[#allocation5 + $0x1a0] sm:$0xff]  }
 0x3b5   :  { %3600 = vmatprep.subr.bf16.mxu0 %v3848_v54 }
 0x3b6   :  { %v1215_v35 = vmax.f32 %v1175_v32, 0.0  ;;  %v1252_v38 = vpack.c.bf16 %v1217_v33, %v1216_v36  ;;  %3601 = vmatpush3.bf16.msra.mxu0 %v3848_v54 }
 0x3b7   :  { %3602 = vmatprep.subr.bf16.mxu0 %v3849_v43 }
 0x3b8   :  { %v1251_v37 = vpack.c.bf16 %v1215_v35, %v1214_v34 }
 0x3ba   :  { %3542 = vmatprep.mubr.bf16.mxu0 %v1251_v37  ;;  %3603 = vmatpush3.bf16.msra.mxu0 %v3849_v43 }
 0x3bb   :  { %3543 = vmatmul.mubr.bf16.gmra.mxu0 %v1252_v38  ;;  %3604 = vmatprep.subr.bf16.mxu0 %v3850_v44 }
 0x3be   :  { %3605 = vmatpush3.bf16.msra.mxu0 %v3850_v44 }
 0x3bf   :  { %3606 = vmatprep.subr.bf16.mxu0 %v3851_v45 }
 0x3c2   :  { %3607 = vmatpush3.bf16.msra.mxu0 %v3851_v45 }
 0x443   :  { %v3516_v47 = vpop.f32.mrf.mxu0 }
 0x444   :  { %v1350_v48 = vadd.f32 %v3516_v47, %v4169_v46 }
 0x445   :  { %v1341_v60 = vpop.f32.mrf.mxu0 }
 0x446   :  { %v1470_v49 = vmax.f32 %v1350_v48, 0.0  ;;  %v1342_v50 = vadd.f32 %v4169_v46, %v1341_v60 }
 0x447   :  { %v3517_v51 = vpop.f32.mrf.mxu0 }
 0x448   :  { %1502 = vst [vmem:[#allocation9 + $0x10] sm:$0xff] %v1470_v49  ;;  %v1468_v52 = vmax.f32 %v1342_v50, 0.0  ;;  %v1353_v53 = vadd.f32 %v3517_v51, %v4169_v46 }
 0x449   :  { %v1344_v2 = vpop.f32.mrf.mxu0 }
 0x44a   :  { %1500 = vst [vmem:[#allocation9] sm:$0xff] %v1468_v52  ;;  %v1471_v55 = vmax.f32 %v1353_v53, 0.0  ;;  %v1345_v56 = vadd.f32 %v4169_v46, %v1344_v2 }
 0x44b   :  { %v3520_v57 = vpop.f32.mrf.mxu0 }
 0x44c   :  { %1503 = vst [vmem:[#allocation9 + $0x18] sm:$0xff] %v1471_v55  ;;  %v1469_v58 = vmax.f32 %v1345_v56, 0.0  ;;  %v1366_v59 = vadd.f32 %v3520_v57, %v4169_v46  ;;  %v1552_v0 = vpack.c.bf16 %v1471_v55, %v1470_v49 }
 0x44d   :  { %v1357_v9 = vpop.f32.mrf.mxu0 }
 0x44e   :  { %1501 = vst [vmem:[#allocation9 + $0x8] sm:$0xff] %v1469_v58  ;;  %v1551_v61 = vpack.c.bf16 %v1469_v58, %v1468_v52  ;;  %v1474_v62 = vmax.f32 %v1366_v59, 0.0  ;;  %v1358_v63 = vadd.f32 %v4169_v46, %v1357_v9 }
 0x44f   :  { %v3521_v1 = vpop.f32.mrf.mxu0 }
 0x450   :  { %1506 = vst [vmem:[#allocation9 + $0x30] sm:$0xff] %v1474_v62  ;;  %v1472_v3 = vmax.f32 %v1358_v63, 0.0  ;;  %v1369_v4 = vadd.f32 %v3521_v1, %v4169_v46  ;;  %3562 = vmatprep.mubr.bf16.mxu1 %v1551_v61 }
 0x451   :  { %v1360_v5 = vpop.f32.mrf.mxu0  ;;  %3563 = vmatmul.mubr.bf16.vlgmr.msra.gmra.mxu1 %v1552_v0 }
 0x452   :  { %1504 = vst [vmem:[#allocation9 + $0x20] sm:$0xff] %v1472_v3  ;;  %v1475_v6 = vmax.f32 %v1369_v4, 0.0  ;;  %v1361_v7 = vadd.f32 %v4169_v46, %v1360_v5 }
 0x453   :  { %v3524_v8 = vpop.f32.mrf.mxu0 }
 0x454   :  { %1507 = vst [vmem:[#allocation9 + $0x38] sm:$0xff] %v1475_v6  ;;  %v1473_v10 = vmax.f32 %v1361_v7, 0.0  ;;  %v1382_v11 = vadd.f32 %v3524_v8, %v4169_v46  ;;  %v1554_v16 = vpack.c.bf16 %v1475_v6, %v1474_v62 }
 0x455   :  { %v1373_v12 = vpop.f32.mrf.mxu0 }
 0x456   :  { %1505 = vst [vmem:[#allocation9 + $0x28] sm:$0xff] %v1473_v10  ;;  %v1553_v13 = vpack.c.bf16 %v1473_v10, %v1472_v3  ;;  %v1478_v14 = vmax.f32 %v1382_v11, 0.0  ;;  %v1374_v15 = vadd.f32 %v4169_v46, %v1373_v12 }
 0x457   :  { %v3525_v17 = vpop.f32.mrf.mxu0 }
 0x458   :  { %1510 = vst [vmem:[#allocation9 + $0x50] sm:$0xff] %v1478_v14  ;;  %v1476_v18 = vmax.f32 %v1374_v15, 0.0  ;;  %v1385_v19 = vadd.f32 %v3525_v17, %v4169_v46  ;;  %3566 = vmatprep.mubr.bf16.mxu1 %v1553_v13 }
 0x459   :  { %v1376_v20 = vpop.f32.mrf.mxu0  ;;  %3567 = vmatmul.mubr.bf16.gmra.mxu1 %v1554_v16 }
 0x45a   :  { %1508 = vst [vmem:[#allocation9 + $0x40] sm:$0xff] %v1476_v18  ;;  %v1479_v21 = vmax.f32 %v1385_v19, 0.0  ;;  %v1377_v22 = vadd.f32 %v4169_v46, %v1376_v20 }
 0x45b   :  { %v3528_v23 = vpop.f32.mrf.mxu0 }
 0x45c   :  { %1511 = vst [vmem:[#allocation9 + $0x58] sm:$0xff] %v1479_v21  ;;  %v1477_v24 = vmax.f32 %v1377_v22, 0.0  ;;  %v1398_v25 = vadd.f32 %v3528_v23, %v4169_v46  ;;  %v1556_v30 = vpack.c.bf16 %v1479_v21, %v1478_v14 }
 0x45d   :  { %v1389_v26 = vpop.f32.mrf.mxu0 }
 0x45e   :  { %1509 = vst [vmem:[#allocation9 + $0x48] sm:$0xff] %v1477_v24  ;;  %v1555_v27 = vpack.c.bf16 %v1477_v24, %v1476_v18  ;;  %v1482_v28 = vmax.f32 %v1398_v25, 0.0  ;;  %v1390_v29 = vadd.f32 %v4169_v46, %v1389_v26 }
 0x45f   :  { %v3529_v31 = vpop.f32.mrf.mxu0 }
 0x460   :  { %1514 = vst [vmem:[#allocation9 + $0x70] sm:$0xff] %v1482_v28  ;;  %v1480_v32 = vmax.f32 %v1390_v29, 0.0  ;;  %v1401_v33 = vadd.f32 %v3529_v31, %v4169_v46  ;;  %3570 = vmatprep.mubr.bf16.mxu1 %v1555_v27 }
 0x461   :  { %v1392_v34 = vpop.f32.mrf.mxu0  ;;  %3571 = vmatmul.mubr.bf16.gmra.mxu1 %v1556_v30 }
 0x462   :  { %1512 = vst [vmem:[#allocation9 + $0x60] sm:$0xff] %v1480_v32  ;;  %v1483_v35 = vmax.f32 %v1401_v33, 0.0  ;;  %v1393_v36 = vadd.f32 %v4169_v46, %v1392_v34  ;;  %v3852_v33 = vld [vmem:[#allocation5 + $0x180] sm:$0xff]   ;;  %v3853_v34 = vld [vmem:[#allocation5 + $0x1f8] sm:$0xff]  }
 0x463   :  { %v3532_v37 = vpop.f32.mrf.mxu0  ;;  %3608 = vmatprep.subr.bf16.mxu0 %v3852_v33  ;;  %3642 = vmatprep.subr.bf16.mxu1 %v3853_v34 }
 0x464   :  { %1515 = vst [vmem:[#allocation9 + $0x78] sm:$0xff] %v1483_v35  ;;  %v1481_v38 = vmax.f32 %v1393_v36, 0.0  ;;  %v1414_v39 = vadd.f32 %v3532_v37, %v4169_v46  ;;  %v1558_v43 = vpack.c.bf16 %v1483_v35, %v1482_v28  ;;  %3609 = vmatpush3.bf16.msra.mxu0 %v3852_v33  ;;  %v3854_v35 = vld [vmem:[#allocation5 + $0x1f0] sm:$0xff]   ;;  %3643 = vmatpush3.bf16.msra.mxu1 %v3853_v34  ;;  %v3855_v36 = vld [vmem:[#allocation5 + $0x1e8] sm:$0xff]   ;;  %v3856_v37 = vld [vmem:[#allocation5 + $0x1e0] sm:$0xff]  }
 0x465   :  { %v1405_v40 = vpop.f32.mrf.mxu0  ;;  %3644 = vmatprep.subr.bf16.mxu1 %v3854_v35 }
 0x466   :  { %1513 = vst [vmem:[#allocation9 + $0x68] sm:$0xff] %v1481_v38  ;;  %v1557_v41 = vpack.c.bf16 %v1481_v38, %v1480_v32  ;;  %v1486_v42 = vmax.f32 %v1414_v39, 0.0  ;;  %v1406_v54 = vadd.f32 %v4169_v46, %v1405_v40  ;;  %v3858_v38 = vld [vmem:[#allocation5 + $0x1d0] sm:$0xff]   ;;  %v3859_v39 = vld [vmem:[#allocation5 + $0x1c8] sm:$0xff]  }
 0x467   :  { %v3533_v44 = vpop.f32.mrf.mxu0 }
 0x468   :  { %1518 = vst [vmem:[#allocation9 + $0x90] sm:$0xff] %v1486_v42  ;;  %v1484_v45 = vmax.f32 %v1406_v54, 0.0  ;;  %v1417_v47 = vadd.f32 %v3533_v44, %v4169_v46  ;;  %3574 = vmatprep.mubr.bf16.mxu1 %v1557_v41  ;;  %3645 = vmatpush3.bf16.msra.mxu1 %v3854_v35 }
 0x469   :  { %v1408_v48 = vpop.f32.mrf.mxu0  ;;  %3575 = vmatmul.mubr.bf16.gmra.mxu1 %v1558_v43  ;;  %3646 = vmatprep.subr.bf16.mxu1 %v3855_v36 }
 0x46a   :  { %1516 = vst [vmem:[#allocation9 + $0x80] sm:$0xff] %v1484_v45  ;;  %v1487_v60 = vmax.f32 %v1417_v47, 0.0  ;;  %v1409_v49 = vadd.f32 %v4169_v46, %v1408_v48 }
 0x46b   :  { %v3536_v50 = vpop.f32.mrf.mxu0 }
 0x46c   :  { %1519 = vst [vmem:[#allocation9 + $0x98] sm:$0xff] %v1487_v60  ;;  %v1485_v51 = vmax.f32 %v1409_v49, 0.0  ;;  %v1430_v52 = vadd.f32 %v3536_v50, %v4169_v46  ;;  %v1560_v57 = vpack.c.bf16 %v1487_v60, %v1486_v42  ;;  %3647 = vmatpush3.bf16.msra.mxu1 %v3855_v36  ;;  %v4203_v42 = vld [vmem:[#allocation7 + $0x5] ss:$0 sm:$0xff] }
 0x46d   :  { %v1421_v53 = vpop.f32.mrf.mxu0  ;;  %3648 = vmatprep.subr.bf16.mxu1 %v3856_v37 }
 0x46e   :  { %1517 = vst [vmem:[#allocation9 + $0x88] sm:$0xff] %v1485_v51  ;;  %v1559_v2 = vpack.c.bf16 %v1485_v51, %v1484_v45  ;;  %v1490_v55 = vmax.f32 %v1430_v52, 0.0  ;;  %v1422_v56 = vadd.f32 %v4169_v46, %v1421_v53 }
 0x46f   :  { %v3537_v58 = vpop.f32.mrf.mxu0 }
 0x470   :  { %1522 = vst [vmem:[#allocation9 + $0xb0] sm:$0xff] %v1490_v55  ;;  %v1488_v59 = vmax.f32 %v1422_v56, 0.0  ;;  %v1433_v9 = vadd.f32 %v3537_v58, %v4169_v46  ;;  %3578 = vmatprep.mubr.bf16.mxu1 %v1559_v2  ;;  %3649 = vmatpush3.bf16.msra.mxu1 %v3856_v37 }
 0x471   :  { %v1424_v61 = vpop.f32.mrf.mxu0  ;;  %3579 = vmatmul.mubr.bf16.gmra.mxu1 %v1560_v57 }
 0x472   :  { %1520 = vst [vmem:[#allocation9 + $0xa0] sm:$0xff] %v1488_v59  ;;  %v1491_v62 = vmax.f32 %v1433_v9, 0.0  ;;  %v1425_v63 = vadd.f32 %v4169_v46, %v1424_v61 }
 0x473   :  { %v3540_v0 = vpop.f32.mrf.mxu0 }
 0x474   :  { %1523 = vst [vmem:[#allocation9 + $0xb8] sm:$0xff] %v1491_v62  ;;  %v1489_v1 = vmax.f32 %v1425_v63, 0.0  ;;  %v1446_v3 = vadd.f32 %v3540_v0, %v4169_v46  ;;  %v1562_v8 = vpack.c.bf16 %v1491_v62, %v1490_v55 }
 0x475   :  { %v1437_v4 = vpop.f32.mrf.mxu0 }
 0x476   :  { %1521 = vst [vmem:[#allocation9 + $0xa8] sm:$0xff] %v1489_v1  ;;  %v1561_v5 = vpack.c.bf16 %v1489_v1, %v1488_v59  ;;  %v1494_v6 = vmax.f32 %v1446_v3, 0.0  ;;  %v1438_v7 = vadd.f32 %v4169_v46, %v1437_v4 }
 0x477   :  { %v3541_v10 = vpop.f32.mrf.mxu0 }
 0x478   :  { %1526 = vst [vmem:[#allocation9 + $0xd0] sm:$0xff] %v1494_v6  ;;  %v1492_v11 = vmax.f32 %v1438_v7, 0.0  ;;  %v1449_v12 = vadd.f32 %v3541_v10, %v4169_v46  ;;  %3582 = vmatprep.mubr.bf16.mxu1 %v1561_v5 }
 0x479   :  { %v1440_v13 = vpop.f32.mrf.mxu0  ;;  %3583 = vmatmul.mubr.bf16.gmra.mxu1 %v1562_v8 }
 0x47a   :  { %1524 = vst [vmem:[#allocation9 + $0xc0] sm:$0xff] %v1492_v11  ;;  %v1495_v14 = vmax.f32 %v1449_v12, 0.0  ;;  %v1441_v15 = vadd.f32 %v4169_v46, %v1440_v13 }
 0x47b   :  { %v3544_v16 = vpop.f32.mrf.mxu0 }
 0x47c   :  { %1527 = vst [vmem:[#allocation9 + $0xd8] sm:$0xff] %v1495_v14  ;;  %v1493_v17 = vmax.f32 %v1441_v15, 0.0  ;;  %v1462_v18 = vadd.f32 %v3544_v16, %v4169_v46  ;;  %v1564_v23 = vpack.c.bf16 %v1495_v14, %v1494_v6 }
 0x47d   :  { %v1453_v19 = vpop.f32.mrf.mxu0 }
 0x47e   :  { %1525 = vst [vmem:[#allocation9 + $0xc8] sm:$0xff] %v1493_v17  ;;  %v1563_v20 = vpack.c.bf16 %v1493_v17, %v1492_v11  ;;  %v1498_v21 = vmax.f32 %v1462_v18, 0.0  ;;  %v1454_v22 = vadd.f32 %v4169_v46, %v1453_v19 }
 0x47f   :  { %v3545_v24 = vpop.f32.mrf.mxu0 }
 0x480   :  { %1530 = vst [vmem:[#allocation9 + $0xf0] sm:$0xff] %v1498_v21  ;;  %v1496_v25 = vmax.f32 %v1454_v22, 0.0  ;;  %v1465_v26 = vadd.f32 %v3545_v24, %v4169_v46  ;;  %3586 = vmatprep.mubr.bf16.mxu1 %v1563_v20 }
 0x481   :  { %v1456_v27 = vpop.f32.mrf.mxu0  ;;  %3587 = vmatmul.mubr.bf16.gmra.mxu1 %v1564_v23 }
 0x482   :  { %1528 = vst [vmem:[#allocation9 + $0xe0] sm:$0xff] %v1496_v25  ;;  %v1499_v28 = vmax.f32 %v1465_v26, 0.0  ;;  %v1457_v29 = vadd.f32 %v4169_v46, %v1456_v27  ;;  %v3857_v46 = vld [vmem:[#allocation5 + $0x1d8] sm:$0xff]  }
 0x483   :  { %3650 = vmatprep.subr.bf16.mxu1 %v3857_v46 }
 0x484   :  { %1531 = vst [vmem:[#allocation9 + $0xf8] sm:$0xff] %v1499_v28  ;;  %v1497_v30 = vmax.f32 %v1457_v29, 0.0  ;;  %v1566_v32 = vpack.c.bf16 %v1499_v28, %v1498_v21  ;;  %3651 = vmatpush3.bf16.msra.mxu1 %v3857_v46 }
 0x485   :  { %3652 = vmatprep.subr.bf16.mxu1 %v3858_v38 }
 0x486   :  { %1529 = vst [vmem:[#allocation9 + $0xe8] sm:$0xff] %v1497_v30  ;;  %v1565_v31 = vpack.c.bf16 %v1497_v30, %v1496_v25 }
 0x488   :  { %3590 = vmatprep.mubr.bf16.mxu1 %v1565_v31  ;;  %3653 = vmatpush3.bf16.msra.mxu1 %v3858_v38 }
 0x489   :  { %3591 = vmatmul.mubr.bf16.gmra.mxu1 %v1566_v32  ;;  %3654 = vmatprep.subr.bf16.mxu1 %v3859_v39 }
 0x48c   :  { %3655 = vmatpush3.bf16.msra.mxu1 %v3859_v39 }
 0x511   :  { %v3564_v40 = vpop.f32.mrf.mxu1 }
 0x512   :  { %v1664_v45 = vadd.f32 %v3564_v40, %v4203_v42 }
 0x513   :  { %v1655_v41 = vpop.f32.mrf.mxu1 }
 0x514   :  { %v1656_v43 = vadd.f32 %v4203_v42, %v1655_v41  ;;  %v1784_v52 = vmax.f32 %v1664_v45, 0.0 }
 0x515   :  { %v3565_v54 = vpop.f32.mrf.mxu1 }
 0x516   :  { %v1667_v44 = vadd.f32 %v3565_v54, %v4203_v42  ;;  %v1782_v50 = vmax.f32 %v1656_v43, 0.0 }
 0x517   :  { %v1658_v47 = vpop.f32.mrf.mxu1 }
 0x518   :  { %v1659_v48 = vadd.f32 %v4203_v42, %v1658_v47  ;;  %v1785_v60 = vmax.f32 %v1667_v44, 0.0 }
 0x519   :  { %v3568_v49 = vpop.f32.mrf.mxu1 }
 0x51a   :  { %v1783_v51 = vmax.f32 %v1659_v48, 0.0  ;;  %v1834_v55 = vpack.c.bf16 %v1785_v60, %v1784_v52  ;;  %v1680_v59 = vadd.f32 %v3568_v49, %v4203_v42 }
 0x51b   :  { %v1671_v53 = vpop.f32.mrf.mxu1 }
 0x51c   :  { %v1833_v2 = vpack.c.bf16 %v1783_v51, %v1782_v50  ;;  %v1672_v57 = vadd.f32 %v4203_v42, %v1671_v53  ;;  %v1788_v3 = vmax.f32 %v1680_v59, 0.0 }
 0x51d   :  { %v3569_v56 = vpop.f32.mrf.mxu1 }
 0x51e   :  { %v1683_v58 = vadd.f32 %v3569_v56, %v4203_v42  ;;  %3610 = vmatprep.mubr.bf16.mxu0 %v1833_v2  ;;  %v1786_v0 = vmax.f32 %v1672_v57, 0.0 }
 0x51f   :  { %v1674_v9 = vpop.f32.mrf.mxu1  ;;  %3611 = vmatmul.mubr.bf16.vlgmr.msra.gmra.mxu0 %v1834_v55 }
 0x520   :  { %v1675_v61 = vadd.f32 %v4203_v42, %v1674_v9  ;;  %v1789_v62 = vmax.f32 %v1683_v58, 0.0 }
 0x521   :  { %v3572_v63 = vpop.f32.mrf.mxu1 }
 0x522   :  { %v1787_v1 = vmax.f32 %v1675_v61, 0.0  ;;  %v1836_v6 = vpack.c.bf16 %v1789_v62, %v1788_v3  ;;  %v1696_v11 = vadd.f32 %v3572_v63, %v4203_v42 }
 0x523   :  { %v1687_v4 = vpop.f32.mrf.mxu1 }
 0x524   :  { %v1835_v5 = vpack.c.bf16 %v1787_v1, %v1786_v0  ;;  %v1688_v8 = vadd.f32 %v4203_v42, %v1687_v4  ;;  %v1792_v18 = vmax.f32 %v1696_v11, 0.0 }
 0x525   :  { %v3573_v7 = vpop.f32.mrf.mxu1 }
 0x526   :  { %v1699_v10 = vadd.f32 %v3573_v7, %v4203_v42  ;;  %3614 = vmatprep.mubr.bf16.mxu0 %v1835_v5  ;;  %v1790_v16 = vmax.f32 %v1688_v8, 0.0 }
 0x527   :  { %v1690_v12 = vpop.f32.mrf.mxu1  ;;  %3615 = vmatmul.mubr.bf16.gmra.mxu0 %v1836_v6 }
 0x528   :  { %v1691_v13 = vadd.f32 %v4203_v42, %v1690_v12  ;;  %v1793_v14 = vmax.f32 %v1699_v10, 0.0 }
 0x529   :  { %v3576_v15 = vpop.f32.mrf.mxu1 }
 0x52a   :  { %v1791_v17 = vmax.f32 %v1691_v13, 0.0  ;;  %v1838_v21 = vpack.c.bf16 %v1793_v14, %v1792_v18  ;;  %v1712_v25 = vadd.f32 %v3576_v15, %v4203_v42 }
 0x52b   :  { %v1703_v19 = vpop.f32.mrf.mxu1 }
 0x52c   :  { %v1837_v20 = vpack.c.bf16 %v1791_v17, %v1790_v16  ;;  %v1704_v23 = vadd.f32 %v4203_v42, %v1703_v19  ;;  %v1796_v32 = vmax.f32 %v1712_v25, 0.0 }
 0x52d   :  { %v3577_v22 = vpop.f32.mrf.mxu1 }
 0x52e   :  { %v1715_v24 = vadd.f32 %v3577_v22, %v4203_v42  ;;  %3618 = vmatprep.mubr.bf16.mxu0 %v1837_v20  ;;  %v1794_v30 = vmax.f32 %v1704_v23, 0.0 }
 0x52f   :  { %v1706_v26 = vpop.f32.mrf.mxu1  ;;  %3619 = vmatmul.mubr.bf16.gmra.mxu0 %v1838_v21 }
 0x530   :  { %v1707_v27 = vadd.f32 %v4203_v42, %v1706_v26  ;;  %v1797_v28 = vmax.f32 %v1715_v24, 0.0 }
 0x531   :  { %v3580_v29 = vpop.f32.mrf.mxu1 }
 0x532   :  { %v1795_v31 = vmax.f32 %v1707_v27, 0.0  ;;  %v1840_v35 = vpack.c.bf16 %v1797_v28, %v1796_v32  ;;  %v1728_v38 = vadd.f32 %v3580_v29, %v4203_v42  ;;  %v3860_v27 = vld [vmem:[#allocation5 + $0x1c0] sm:$0xff]   ;;  %v3861_v28 = vld [vmem:[#allocation5 + $0x238] sm:$0xff]   ;;  %v3862_v29 = vld [vmem:[#allocation5 + $0x230] sm:$0xff]  }
 0x533   :  { %v1719_v33 = vpop.f32.mrf.mxu1  ;;  %3656 = vmatprep.subr.bf16.mxu1 %v3860_v27  ;;  %3690 = vmatprep.subr.bf16.mxu0 %v3861_v28  ;;  %v3866_v32 = vld [vmem:[#allocation5 + $0x210] sm:$0xff]  }
 0x534   :  { %v1839_v34 = vpack.c.bf16 %v1795_v31, %v1794_v30  ;;  %v1720_v37 = vadd.f32 %v4203_v42, %v1719_v33  ;;  %v1800_v45 = vmax.f32 %v1728_v38, 0.0  ;;  %3657 = vmatpush3.bf16.msra.mxu1 %v3860_v27  ;;  %3691 = vmatpush3.bf16.msra.mxu0 %v3861_v28  ;;  %v3863_v30 = vld [vmem:[#allocation5 + $0x228] sm:$0xff]   ;;  %v3865_v31 = vld [vmem:[#allocation5 + $0x218] sm:$0xff]  }
 0x535   :  { %v3581_v36 = vpop.f32.mrf.mxu1  ;;  %3692 = vmatprep.subr.bf16.mxu0 %v3862_v29  ;;  %v3867_v33 = vld [vmem:[#allocation5 + $0x208] sm:$0xff]  }
 0x536   :  { %v1731_v46 = vadd.f32 %v3581_v36, %v4203_v42  ;;  %3622 = vmatprep.mubr.bf16.mxu0 %v1839_v34  ;;  %v1798_v43 = vmax.f32 %v1720_v37, 0.0  ;;  %v4237_v36 = vld [vmem:[#allocation7 + $0x6] ss:$0 sm:$0xff] }
 0x537   :  { %v1722_v39 = vpop.f32.mrf.mxu1  ;;  %3623 = vmatmul.mubr.bf16.gmra.mxu0 %v1840_v35 }
 0x538   :  { %v1723_v40 = vadd.f32 %v4203_v42, %v1722_v39  ;;  %v1801_v41 = vmax.f32 %v1731_v46, 0.0  ;;  %3693 = vmatpush3.bf16.msra.mxu0 %v3862_v29 }
 0x539   :  { %v3584_v54 = vpop.f32.mrf.mxu1  ;;  %3694 = vmatprep.subr.bf16.mxu0 %v3863_v30 }
 0x53a   :  { %v1799_v44 = vmax.f32 %v1723_v40, 0.0  ;;  %v1842_v60 = vpack.c.bf16 %v1801_v41, %v1800_v45  ;;  %v1744_v52 = vadd.f32 %v3584_v54, %v4203_v42 }
 0x53b   :  { %v1735_v47 = vpop.f32.mrf.mxu1 }
 0x53c   :  { %v1841_v48 = vpack.c.bf16 %v1799_v44, %v1798_v43  ;;  %v1736_v50 = vadd.f32 %v4203_v42, %v1735_v47  ;;  %v1804_v59 = vmax.f32 %v1744_v52, 0.0  ;;  %3695 = vmatpush3.bf16.msra.mxu0 %v3863_v30 }
 0x53d   :  { %v3585_v49 = vpop.f32.mrf.mxu1 }
 0x53e   :  { %v1747_v51 = vadd.f32 %v3585_v49, %v4203_v42  ;;  %3626 = vmatprep.mubr.bf16.mxu0 %v1841_v48  ;;  %v1802_v57 = vmax.f32 %v1736_v50, 0.0 }
 0x53f   :  { %v1738_v53 = vpop.f32.mrf.mxu1  ;;  %3627 = vmatmul.mubr.bf16.gmra.mxu0 %v1842_v60 }
 0x540   :  { %v1739_v2 = vadd.f32 %v4203_v42, %v1738_v53  ;;  %v1805_v55 = vmax.f32 %v1747_v51, 0.0 }
 0x541   :  { %v3588_v56 = vpop.f32.mrf.mxu1 }
 0x542   :  { %v1803_v58 = vmax.f32 %v1739_v2, 0.0  ;;  %v1844_v62 = vpack.c.bf16 %v1805_v55, %v1804_v59  ;;  %v1760_v3 = vadd.f32 %v3588_v56, %v4203_v42 }
 0x543   :  { %v1751_v9 = vpop.f32.mrf.mxu1 }
 0x544   :  { %v1843_v61 = vpack.c.bf16 %v1803_v58, %v1802_v57  ;;  %v1752_v0 = vadd.f32 %v4203_v42, %v1751_v9  ;;  %v1808_v11 = vmax.f32 %v1760_v3, 0.0 }
 0x545   :  { %v3589_v63 = vpop.f32.mrf.mxu1 }
 0x546   :  { %v1763_v1 = vadd.f32 %v3589_v63, %v4203_v42  ;;  %3630 = vmatprep.mubr.bf16.mxu0 %v1843_v61  ;;  %v1806_v8 = vmax.f32 %v1752_v0, 0.0 }
 0x547   :  { %v1754_v4 = vpop.f32.mrf.mxu1  ;;  %3631 = vmatmul.mubr.bf16.gmra.mxu0 %v1844_v62 }
 0x548   :  { %v1755_v5 = vadd.f32 %v4203_v42, %v1754_v4  ;;  %v1809_v6 = vmax.f32 %v1763_v1, 0.0 }
 0x549   :  { %v3592_v7 = vpop.f32.mrf.mxu1 }
 0x54a   :  { %v1807_v10 = vmax.f32 %v1755_v5, 0.0  ;;  %v1846_v14 = vpack.c.bf16 %v1809_v6, %v1808_v11  ;;  %v1776_v18 = vadd.f32 %v3592_v7, %v4203_v42 }
 0x54b   :  { %v1767_v12 = vpop.f32.mrf.mxu1 }
 0x54c   :  { %v1845_v13 = vpack.c.bf16 %v1807_v10, %v1806_v8  ;;  %v1768_v16 = vadd.f32 %v4203_v42, %v1767_v12  ;;  %v1812_v24 = vmax.f32 %v1776_v18, 0.0 }
 0x54d   :  { %v3593_v15 = vpop.f32.mrf.mxu1 }
 0x54e   :  { %v1779_v17 = vadd.f32 %v3593_v15, %v4203_v42  ;;  %3634 = vmatprep.mubr.bf16.mxu0 %v1845_v13  ;;  %v1810_v22 = vmax.f32 %v1768_v16, 0.0 }
 0x54f   :  { %v1770_v19 = vpop.f32.mrf.mxu1  ;;  %3635 = vmatmul.mubr.bf16.gmra.mxu0 %v1846_v14 }
 0x550   :  { %v1771_v20 = vadd.f32 %v4203_v42, %v1770_v19  ;;  %v1813_v21 = vmax.f32 %v1779_v17, 0.0  ;;  %v3864_v42 = vld [vmem:[#allocation5 + $0x220] sm:$0xff]  }
 0x551   :  { %3696 = vmatprep.subr.bf16.mxu0 %v3864_v42 }
 0x552   :  { %v1811_v23 = vmax.f32 %v1771_v20, 0.0  ;;  %v1848_v26 = vpack.c.bf16 %v1813_v21, %v1812_v24  ;;  %3697 = vmatpush3.bf16.msra.mxu0 %v3864_v42 }
 0x553   :  { %3698 = vmatprep.subr.bf16.mxu0 %v3865_v31 }
 0x554   :  { %v1847_v25 = vpack.c.bf16 %v1811_v23, %v1810_v22 }
 0x556   :  { %3638 = vmatprep.mubr.bf16.mxu0 %v1847_v25  ;;  %3699 = vmatpush3.bf16.msra.mxu0 %v3865_v31 }
 0x557   :  { %3639 = vmatmul.mubr.bf16.gmra.mxu0 %v1848_v26  ;;  %3700 = vmatprep.subr.bf16.mxu0 %v3866_v32 }
 0x55a   :  { %3701 = vmatpush3.bf16.msra.mxu0 %v3866_v32 }
 0x55b   :  { %3702 = vmatprep.subr.bf16.mxu0 %v3867_v33 }
 0x55e   :  { %3703 = vmatpush3.bf16.msra.mxu0 %v3867_v33 }
 0x5df   :  { %v3612_v34 = vpop.f32.mrf.mxu0 }
 0x5e0   :  { %v1946_v39 = vadd.f32 %v3612_v34, %v4237_v36 }
 0x5e1   :  { %v1937_v35 = vpop.f32.mrf.mxu0 }
 0x5e2   :  { %v1938_v46 = vadd.f32 %v4237_v36, %v1937_v35  ;;  %v2066_v47 = vmax.f32 %v1946_v39, 0.0 }
 0x5e3   :  { %v3613_v37 = vpop.f32.mrf.mxu0 }
 0x5e4   :  { %v1949_v38 = vadd.f32 %v3613_v37, %v4237_v36  ;;  %v2064_v44 = vmax.f32 %v1938_v46, 0.0 }
 0x5e5   :  { %v1940_v40 = vpop.f32.mrf.mxu0 }
 0x5e6   :  { %v1941_v41 = vadd.f32 %v4237_v36, %v1940_v40  ;;  %v2067_v54 = vmax.f32 %v1949_v38, 0.0 }
 0x5e7   :  { %v3616_v43 = vpop.f32.mrf.mxu0 }
 0x5e8   :  { %v2065_v45 = vmax.f32 %v1941_v41, 0.0  ;;  %v2116_v49 = vpack.c.bf16 %v2067_v54, %v2066_v47  ;;  %v1962_v53 = vadd.f32 %v3616_v43, %v4237_v36 }
 0x5e9   :  { %v1953_v48 = vpop.f32.mrf.mxu0 }
 0x5ea   :  { %v2115_v60 = vpack.c.bf16 %v2065_v45, %v2064_v44  ;;  %v1954_v51 = vadd.f32 %v4237_v36, %v1953_v48  ;;  %v2070_v9 = vmax.f32 %v1962_v53, 0.0 }
 0x5eb   :  { %v3617_v50 = vpop.f32.mrf.mxu0 }
 0x5ec   :  { %v1965_v52 = vadd.f32 %v3617_v50, %v4237_v36  ;;  %3658 = vmatprep.mubr.bf16.mxu1 %v2115_v60  ;;  %v2068_v58 = vmax.f32 %v1954_v51, 0.0 }
 0x5ed   :  { %v1956_v2 = vpop.f32.mrf.mxu0  ;;  %3659 = vmatmul.mubr.bf16.vlgmr.msra.gmra.mxu1 %v2116_v49 }
 0x5ee   :  { %v1957_v55 = vadd.f32 %v4237_v36, %v1956_v2  ;;  %v2071_v56 = vmax.f32 %v1965_v52, 0.0 }
 0x5ef   :  { %v3620_v57 = vpop.f32.mrf.mxu0 }
 0x5f0   :  { %v2069_v59 = vmax.f32 %v1957_v55, 0.0  ;;  %v2118_v63 = vpack.c.bf16 %v2071_v56, %v2070_v9  ;;  %v1978_v4 = vadd.f32 %v3620_v57, %v4237_v36 }
 0x5f1   :  { %v1969_v61 = vpop.f32.mrf.mxu0 }
 0x5f2   :  { %v2117_v62 = vpack.c.bf16 %v2069_v59, %v2068_v58  ;;  %v1970_v1 = vadd.f32 %v4237_v36, %v1969_v61  ;;  %v2074_v12 = vmax.f32 %v1978_v4, 0.0 }
 0x5f3   :  { %v3621_v0 = vpop.f32.mrf.mxu0 }
 0x5f4   :  { %v1981_v3 = vadd.f32 %v3621_v0, %v4237_v36  ;;  %3662 = vmatprep.mubr.bf16.mxu1 %v2117_v62  ;;  %v2072_v10 = vmax.f32 %v1970_v1, 0.0 }
 0x5f5   :  { %v1972_v5 = vpop.f32.mrf.mxu0  ;;  %3663 = vmatmul.mubr.bf16.gmra.mxu1 %v2118_v63 }
 0x5f6   :  { %v1973_v6 = vadd.f32 %v4237_v36, %v1972_v5  ;;  %v2075_v7 = vmax.f32 %v1981_v3, 0.0 }
 0x5f7   :  { %v3624_v8 = vpop.f32.mrf.mxu0 }
 0x5f8   :  { %v2073_v11 = vmax.f32 %v1973_v6, 0.0  ;;  %v2120_v15 = vpack.c.bf16 %v2075_v7, %v2074_v12  ;;  %v1994_v19 = vadd.f32 %v3624_v8, %v4237_v36 }
 0x5f9   :  { %v1985_v13 = vpop.f32.mrf.mxu0 }
 0x5fa   :  { %v2119_v14 = vpack.c.bf16 %v2073_v11, %v2072_v10  ;;  %v1986_v17 = vadd.f32 %v4237_v36, %v1985_v13  ;;  %v2078_v26 = vmax.f32 %v1994_v19, 0.0 }
 0x5fb   :  { %v3625_v16 = vpop.f32.mrf.mxu0 }
 0x5fc   :  { %v1997_v18 = vadd.f32 %v3625_v16, %v4237_v36  ;;  %3666 = vmatprep.mubr.bf16.mxu1 %v2119_v14  ;;  %v2076_v24 = vmax.f32 %v1986_v17, 0.0 }
 0x5fd   :  { %v1988_v20 = vpop.f32.mrf.mxu0  ;;  %3667 = vmatmul.mubr.bf16.gmra.mxu1 %v2120_v15 }
 0x5fe   :  { %v1989_v21 = vadd.f32 %v4237_v36, %v1988_v20  ;;  %v2079_v22 = vmax.f32 %v1997_v18, 0.0 }
 0x5ff   :  { %v3628_v23 = vpop.f32.mrf.mxu0 }
 0x600   :  { %v2077_v25 = vmax.f32 %v1989_v21, 0.0  ;;  %v2122_v29 = vpack.c.bf16 %v2079_v22, %v2078_v26  ;;  %v2010_v32 = vadd.f32 %v3628_v23, %v4237_v36  ;;  %v3868_v21 = vld [vmem:[#allocation5 + $0x200] sm:$0xff]   ;;  %v3869_v22 = vld [vmem:[#allocation5 + $0x278] sm:$0xff]   ;;  %v3870_v23 = vld [vmem:[#allocation5 + $0x270] sm:$0xff]  }
 0x601   :  { %v2001_v27 = vpop.f32.mrf.mxu0  ;;  %3704 = vmatprep.subr.bf16.mxu0 %v3868_v21  ;;  %3738 = vmatprep.subr.bf16.mxu1 %v3869_v22  ;;  %v3874_v26 = vld [vmem:[#allocation5 + $0x250] sm:$0xff]  }
 0x602   :  { %v2121_v28 = vpack.c.bf16 %v2077_v25, %v2076_v24  ;;  %v2002_v42 = vadd.f32 %v4237_v36, %v2001_v27  ;;  %v2082_v39 = vmax.f32 %v2010_v32, 0.0  ;;  %3705 = vmatpush3.bf16.msra.mxu0 %v3868_v21  ;;  %3739 = vmatpush3.bf16.msra.mxu1 %v3869_v22  ;;  %v3871_v24 = vld [vmem:[#allocation5 + $0x268] sm:$0xff]   ;;  %v3873_v25 = vld [vmem:[#allocation5 + $0x258] sm:$0xff]  }
 0x603   :  { %v3629_v30 = vpop.f32.mrf.mxu0  ;;  %3740 = vmatprep.subr.bf16.mxu1 %v3870_v23  ;;  %v3875_v27 = vld [vmem:[#allocation5 + $0x248] sm:$0xff]  }
 0x604   :  { %v2013_v31 = vadd.f32 %v3629_v30, %v4237_v36  ;;  %3670 = vmatprep.mubr.bf16.mxu1 %v2121_v28  ;;  %v2080_v46 = vmax.f32 %v2002_v42, 0.0  ;;  %v4271_v30 = vld [vmem:[#allocation7 + $0x7] ss:$0 sm:$0xff] }
 0x605   :  { %v2004_v33 = vpop.f32.mrf.mxu0  ;;  %3671 = vmatmul.mubr.bf16.gmra.mxu1 %v2122_v29 }
 0x606   :  { %v2005_v34 = vadd.f32 %v4237_v36, %v2004_v33  ;;  %v2083_v35 = vmax.f32 %v2013_v31, 0.0  ;;  %3741 = vmatpush3.bf16.msra.mxu1 %v3870_v23 }
 0x607   :  { %v3632_v37 = vpop.f32.mrf.mxu0  ;;  %3742 = vmatprep.subr.bf16.mxu1 %v3871_v24 }
 0x608   :  { %v2081_v38 = vmax.f32 %v2005_v34, 0.0  ;;  %v2124_v54 = vpack.c.bf16 %v2083_v35, %v2082_v39  ;;  %v2026_v47 = vadd.f32 %v3632_v37, %v4237_v36 }
 0x609   :  { %v2017_v40 = vpop.f32.mrf.mxu0 }
 0x60a   :  { %v2123_v41 = vpack.c.bf16 %v2081_v38, %v2080_v46  ;;  %v2018_v44 = vadd.f32 %v4237_v36, %v2017_v40  ;;  %v2086_v53 = vmax.f32 %v2026_v47, 0.0  ;;  %3743 = vmatpush3.bf16.msra.mxu1 %v3871_v24 }
 0x60b   :  { %v3633_v43 = vpop.f32.mrf.mxu0 }
 0x60c   :  { %v2029_v45 = vadd.f32 %v3633_v43, %v4237_v36  ;;  %3674 = vmatprep.mubr.bf16.mxu1 %v2123_v41  ;;  %v2084_v51 = vmax.f32 %v2018_v44, 0.0 }
 0x60d   :  { %v2020_v48 = vpop.f32.mrf.mxu0  ;;  %3675 = vmatmul.mubr.bf16.gmra.mxu1 %v2124_v54 }
 0x60e   :  { %v2021_v60 = vadd.f32 %v4237_v36, %v2020_v48  ;;  %v2087_v49 = vmax.f32 %v2029_v45, 0.0 }
 0x60f   :  { %v3636_v50 = vpop.f32.mrf.mxu0 }
 0x610   :  { %v2085_v52 = vmax.f32 %v2021_v60, 0.0  ;;  %v2126_v56 = vpack.c.bf16 %v2087_v49, %v2086_v53  ;;  %v2042_v9 = vadd.f32 %v3636_v50, %v4237_v36 }
 0x611   :  { %v2033_v2 = vpop.f32.mrf.mxu0 }
 0x612   :  { %v2125_v55 = vpack.c.bf16 %v2085_v52, %v2084_v51  ;;  %v2034_v58 = vadd.f32 %v4237_v36, %v2033_v2  ;;  %v2090_v4 = vmax.f32 %v2042_v9, 0.0 }
 0x613   :  { %v3637_v57 = vpop.f32.mrf.mxu0 }
 0x614   :  { %v2045_v59 = vadd.f32 %v3637_v57, %v4237_v36  ;;  %3678 = vmatprep.mubr.bf16.mxu1 %v2125_v55  ;;  %v2088_v1 = vmax.f32 %v2034_v58, 0.0 }
 0x615   :  { %v2036_v61 = vpop.f32.mrf.mxu0  ;;  %3679 = vmatmul.mubr.bf16.gmra.mxu1 %v2126_v56 }
 0x616   :  { %v2037_v62 = vadd.f32 %v4237_v36, %v2036_v61  ;;  %v2091_v63 = vmax.f32 %v2045_v59, 0.0 }
 0x617   :  { %v3640_v0 = vpop.f32.mrf.mxu0 }
 0x618   :  { %v2089_v3 = vmax.f32 %v2037_v62, 0.0  ;;  %v2128_v7 = vpack.c.bf16 %v2091_v63, %v2090_v4  ;;  %v2058_v12 = vadd.f32 %v3640_v0, %v4237_v36 }
 0x619   :  { %v2049_v5 = vpop.f32.mrf.mxu0 }
 0x61a   :  { %v2127_v6 = vpack.c.bf16 %v2089_v3, %v2088_v1  ;;  %v2050_v10 = vadd.f32 %v4237_v36, %v2049_v5  ;;  %v2094_v18 = vmax.f32 %v2058_v12, 0.0 }
 0x61b   :  { %v3641_v8 = vpop.f32.mrf.mxu0 }
 0x61c   :  { %v2061_v11 = vadd.f32 %v3641_v8, %v4237_v36  ;;  %3682 = vmatprep.mubr.bf16.mxu1 %v2127_v6  ;;  %v2092_v16 = vmax.f32 %v2050_v10, 0.0 }
 0x61d   :  { %v2052_v13 = vpop.f32.mrf.mxu0  ;;  %3683 = vmatmul.mubr.bf16.gmra.mxu1 %v2128_v7 }
 0x61e   :  { %v2053_v14 = vadd.f32 %v4237_v36, %v2052_v13  ;;  %v2095_v15 = vmax.f32 %v2061_v11, 0.0  ;;  %v3872_v36 = vld [vmem:[#allocation5 + $0x260] sm:$0xff]  }
 0x61f   :  { %3744 = vmatprep.subr.bf16.mxu1 %v3872_v36 }
 0x620   :  { %v2093_v17 = vmax.f32 %v2053_v14, 0.0  ;;  %v2130_v20 = vpack.c.bf16 %v2095_v15, %v2094_v18  ;;  %3745 = vmatpush3.bf16.msra.mxu1 %v3872_v36 }
 0x621   :  { %3746 = vmatprep.subr.bf16.mxu1 %v3873_v25 }
 0x622   :  { %v2129_v19 = vpack.c.bf16 %v2093_v17, %v2092_v16 }
 0x624   :  { %3686 = vmatprep.mubr.bf16.mxu1 %v2129_v19  ;;  %3747 = vmatpush3.bf16.msra.mxu1 %v3873_v25 }
 0x625   :  { %3687 = vmatmul.mubr.bf16.gmra.mxu1 %v2130_v20  ;;  %3748 = vmatprep.subr.bf16.mxu1 %v3874_v26 }
 0x628   :  { %3749 = vmatpush3.bf16.msra.mxu1 %v3874_v26 }
 0x629   :  { %3750 = vmatprep.subr.bf16.mxu1 %v3875_v27 }
 0x62c   :  { %3751 = vmatpush3.bf16.msra.mxu1 %v3875_v27 }
 0x6ad   :  { %v3660_v28 = vpop.f32.mrf.mxu1 }
 0x6ae   :  { %v2228_v33 = vadd.f32 %v3660_v28, %v4271_v30 }
 0x6af   :  { %v2219_v29 = vpop.f32.mrf.mxu1 }
 0x6b0   :  { %v2220_v31 = vadd.f32 %v4271_v30, %v2219_v29  ;;  %v2348_v40 = vmax.f32 %v2228_v33, 0.0 }
 0x6b1   :  { %v3661_v42 = vpop.f32.mrf.mxu1 }
 0x6b2   :  { %v2231_v32 = vadd.f32 %v3661_v42, %v4271_v30  ;;  %v2346_v38 = vmax.f32 %v2220_v31, 0.0 }
 0x6b3   :  { %v2222_v34 = vpop.f32.mrf.mxu1 }
 0x6b4   :  { %v2223_v35 = vadd.f32 %v4271_v30, %v2222_v34  ;;  %v2349_v37 = vmax.f32 %v2231_v32, 0.0 }
 0x6b5   :  { %v3664_v46 = vpop.f32.mrf.mxu1 }
 0x6b6   :  { %v2347_v39 = vmax.f32 %v2223_v35, 0.0  ;;  %v2398_v43 = vpack.c.bf16 %v2349_v37, %v2348_v40  ;;  %v2244_v48 = vadd.f32 %v3664_v46, %v4271_v30 }
 0x6b7   :  { %v2235_v41 = vpop.f32.mrf.mxu1 }
 0x6b8   :  { %v2397_v54 = vpack.c.bf16 %v2347_v39, %v2346_v38  ;;  %v2236_v45 = vadd.f32 %v4271_v30, %v2235_v41  ;;  %v2352_v2 = vmax.f32 %v2244_v48, 0.0 }
 0x6b9   :  { %v3665_v44 = vpop.f32.mrf.mxu1 }
 0x6ba   :  { %v2247_v47 = vadd.f32 %v3665_v44, %v4271_v30  ;;  %3706 = vmatprep.mubr.bf16.mxu0 %v2397_v54  ;;  %v2350_v52 = vmax.f32 %v2236_v45, 0.0 }
 0x6bb   :  { %v2238_v60 = vpop.f32.mrf.mxu1  ;;  %3707 = vmatmul.mubr.bf16.vlgmr.msra.gmra.mxu0 %v2398_v43 }
 0x6bc   :  { %v2239_v49 = vadd.f32 %v4271_v30, %v2238_v60  ;;  %v2353_v50 = vmax.f32 %v2247_v47, 0.0 }
 0x6bd   :  { %v3668_v51 = vpop.f32.mrf.mxu1 }
 0x6be   :  { %v2351_v53 = vmax.f32 %v2239_v49, 0.0  ;;  %v2400_v57 = vpack.c.bf16 %v2353_v50, %v2352_v2  ;;  %v2260_v61 = vadd.f32 %v3668_v51, %v4271_v30 }
 0x6bf   :  { %v2251_v55 = vpop.f32.mrf.mxu1 }
 0x6c0   :  { %v2399_v56 = vpack.c.bf16 %v2351_v53, %v2350_v52  ;;  %v2252_v59 = vadd.f32 %v4271_v30, %v2251_v55  ;;  %v2356_v5 = vmax.f32 %v2260_v61, 0.0 }
 0x6c1   :  { %v3669_v58 = vpop.f32.mrf.mxu1 }
 0x6c2   :  { %v2263_v9 = vadd.f32 %v3669_v58, %v4271_v30  ;;  %3710 = vmatprep.mubr.bf16.mxu0 %v2399_v56  ;;  %v2354_v3 = vmax.f32 %v2252_v59, 0.0 }
 0x6c3   :  { %v2254_v62 = vpop.f32.mrf.mxu1  ;;  %3711 = vmatmul.mubr.bf16.gmra.mxu0 %v2400_v57 }
 0x6c4   :  { %v2255_v63 = vadd.f32 %v4271_v30, %v2254_v62  ;;  %v2357_v0 = vmax.f32 %v2263_v9, 0.0 }
 0x6c5   :  { %v3672_v1 = vpop.f32.mrf.mxu1 }
 0x6c6   :  { %v2355_v4 = vmax.f32 %v2255_v63, 0.0  ;;  %v2402_v8 = vpack.c.bf16 %v2357_v0, %v2356_v5  ;;  %v2276_v13 = vadd.f32 %v3672_v1, %v4271_v30 }
 0x6c7   :  { %v2267_v6 = vpop.f32.mrf.mxu1 }
 0x6c8   :  { %v2401_v7 = vpack.c.bf16 %v2355_v4, %v2354_v3  ;;  %v2268_v11 = vadd.f32 %v4271_v30, %v2267_v6  ;;  %v2360_v20 = vmax.f32 %v2276_v13, 0.0 }
 0x6c9   :  { %v3673_v10 = vpop.f32.mrf.mxu1 }
 0x6ca   :  { %v2279_v12 = vadd.f32 %v3673_v10, %v4271_v30  ;;  %3714 = vmatprep.mubr.bf16.mxu0 %v2401_v7  ;;  %v2358_v18 = vmax.f32 %v2268_v11, 0.0 }
 0x6cb   :  { %v2270_v14 = vpop.f32.mrf.mxu1  ;;  %3715 = vmatmul.mubr.bf16.gmra.mxu0 %v2402_v8 }
 0x6cc   :  { %v2271_v15 = vadd.f32 %v4271_v30, %v2270_v14  ;;  %v2361_v16 = vmax.f32 %v2279_v12, 0.0 }
 0x6cd   :  { %v3676_v17 = vpop.f32.mrf.mxu1 }
 0x6ce   :  { %v2359_v19 = vmax.f32 %v2271_v15, 0.0  ;;  %v2404_v23 = vpack.c.bf16 %v2361_v16, %v2360_v20  ;;  %v2292_v26 = vadd.f32 %v3676_v17, %v4271_v30  ;;  %v3876_v15 = vld [vmem:[#allocation5 + $0x240] sm:$0xff]  }
 0x6cf   :  { %v2283_v21 = vpop.f32.mrf.mxu1  ;;  %3752 = vmatprep.subr.bf16.mxu1 %v3876_v15 }
 0x6d0   :  { %v2403_v22 = vpack.c.bf16 %v2359_v19, %v2358_v18  ;;  %v2284_v36 = vadd.f32 %v4271_v30, %v2283_v21  ;;  %v2364_v33 = vmax.f32 %v2292_v26, 0.0  ;;  %3753 = vmatpush3.bf16.msra.mxu1 %v3876_v15  ;;  %v4305_v18 = vld [vmem:[#allocation7 + $0x8] ss:$0 sm:$0xff] }
 0x6d1   :  { %v3677_v24 = vpop.f32.mrf.mxu1 }
 0x6d2   :  { %v2295_v25 = vadd.f32 %v3677_v24, %v4271_v30  ;;  %3718 = vmatprep.mubr.bf16.mxu0 %v2403_v22  ;;  %v2362_v31 = vmax.f32 %v2284_v36, 0.0 }
 0x6d3   :  { %v2286_v27 = vpop.f32.mrf.mxu1  ;;  %3719 = vmatmul.mubr.bf16.gmra.mxu0 %v2404_v23 }
 0x6d4   :  { %v2287_v28 = vadd.f32 %v4271_v30, %v2286_v27  ;;  %v2365_v29 = vmax.f32 %v2295_v25, 0.0 }
 0x6d5   :  { %v3680_v42 = vpop.f32.mrf.mxu1 }
 0x6d6   :  { %v2363_v32 = vmax.f32 %v2287_v28, 0.0  ;;  %v2406_v37 = vpack.c.bf16 %v2365_v29, %v2364_v33  ;;  %v2308_v40 = vadd.f32 %v3680_v42, %v4271_v30 }
 0x6d7   :  { %v2299_v34 = vpop.f32.mrf.mxu1 }
 0x6d8   :  { %v2405_v35 = vpack.c.bf16 %v2363_v32, %v2362_v31  ;;  %v2300_v38 = vadd.f32 %v4271_v30, %v2299_v34  ;;  %v2368_v48 = vmax.f32 %v2308_v40, 0.0 }
 0x6d9   :  { %v3681_v46 = vpop.f32.mrf.mxu1 }
 0x6da   :  { %v2311_v39 = vadd.f32 %v3681_v46, %v4271_v30  ;;  %3722 = vmatprep.mubr.bf16.mxu0 %v2405_v35  ;;  %v2366_v45 = vmax.f32 %v2300_v38, 0.0 }
 0x6db   :  { %v2302_v41 = vpop.f32.mrf.mxu1  ;;  %3723 = vmatmul.mubr.bf16.gmra.mxu0 %v2406_v37 }
 0x6dc   :  { %v2303_v54 = vadd.f32 %v4271_v30, %v2302_v41  ;;  %v2369_v43 = vmax.f32 %v2311_v39, 0.0 }
 0x6dd   :  { %v3684_v44 = vpop.f32.mrf.mxu1 }
 0x6de   :  { %v2367_v47 = vmax.f32 %v2303_v54, 0.0  ;;  %v2408_v50 = vpack.c.bf16 %v2369_v43, %v2368_v48  ;;  %v2324_v2 = vadd.f32 %v3684_v44, %v4271_v30 }
 0x6df   :  { %v2315_v60 = vpop.f32.mrf.mxu1 }
 0x6e0   :  { %v2407_v49 = vpack.c.bf16 %v2367_v47, %v2366_v45  ;;  %v2316_v52 = vadd.f32 %v4271_v30, %v2315_v60  ;;  %v2372_v61 = vmax.f32 %v2324_v2, 0.0 }
 0x6e1   :  { %v3685_v51 = vpop.f32.mrf.mxu1 }
 0x6e2   :  { %v2327_v53 = vadd.f32 %v3685_v51, %v4271_v30  ;;  %3726 = vmatprep.mubr.bf16.mxu0 %v2407_v49  ;;  %v2370_v59 = vmax.f32 %v2316_v52, 0.0 }
 0x6e3   :  { %v2318_v55 = vpop.f32.mrf.mxu1  ;;  %3727 = vmatmul.mubr.bf16.gmra.mxu0 %v2408_v50 }
 0x6e4   :  { %v2319_v56 = vadd.f32 %v4271_v30, %v2318_v55  ;;  %v2373_v57 = vmax.f32 %v2327_v53, 0.0 }
 0x6e5   :  { %v3688_v58 = vpop.f32.mrf.mxu1 }
 0x6e6   :  { %v2371_v9 = vmax.f32 %v2319_v56, 0.0  ;;  %v2410_v0 = vpack.c.bf16 %v2373_v57, %v2372_v61  ;;  %v2340_v5 = vadd.f32 %v3688_v58, %v4271_v30 }
 0x6e7   :  { %v2331_v62 = vpop.f32.mrf.mxu1 }
 0x6e8   :  { %v2409_v63 = vpack.c.bf16 %v2371_v9, %v2370_v59  ;;  %v2332_v3 = vadd.f32 %v4271_v30, %v2331_v62  ;;  %v2376_v12 = vmax.f32 %v2340_v5, 0.0 }
 0x6e9   :  { %v3689_v1 = vpop.f32.mrf.mxu1 }
 0x6ea   :  { %v2343_v4 = vadd.f32 %v3689_v1, %v4271_v30  ;;  %3730 = vmatprep.mubr.bf16.mxu0 %v2409_v63  ;;  %v2374_v10 = vmax.f32 %v2332_v3, 0.0 }
 0x6eb   :  { %v2334_v6 = vpop.f32.mrf.mxu1  ;;  %3731 = vmatmul.mubr.bf16.gmra.mxu0 %v2410_v0 }
 0x6ec   :  { %v2335_v7 = vadd.f32 %v4271_v30, %v2334_v6  ;;  %v2377_v8 = vmax.f32 %v2343_v4, 0.0 }
 0x6ee   :  { %v2375_v11 = vmax.f32 %v2335_v7, 0.0  ;;  %v2412_v14 = vpack.c.bf16 %v2377_v8, %v2376_v12 }
 0x6f0   :  { %v2411_v13 = vpack.c.bf16 %v2375_v11, %v2374_v10 }
 0x6f2   :  { %3734 = vmatprep.mubr.bf16.mxu0 %v2411_v13 }
 0x6f3   :  { %3735 = vmatmul.mubr.bf16.gmra.mxu0 %v2412_v14 }
 0x77b   :  { %v3708_v16 = vpop.f32.mrf.mxu0 }
 0x77c   :  { %v2510_v21 = vadd.f32 %v3708_v16, %v4305_v18 }
 0x77d   :  { %v2501_v17 = vpop.f32.mrf.mxu0 }
 0x77e   :  { %v2502_v20 = vadd.f32 %v4305_v18, %v2501_v17  ;;  %v2630_v27 = vmax.f32 %v2510_v21, 0.0 }
 0x77f   :  { %v3709_v19 = vpop.f32.mrf.mxu0 }
 0x780   :  { %v2513_v30 = vadd.f32 %v3709_v19, %v4305_v18  ;;  %v2628_v25 = vmax.f32 %v2502_v20, 0.0 }
 0x781   :  { %v2504_v22 = vpop.f32.mrf.mxu0 }
 0x782   :  { %v2505_v23 = vadd.f32 %v4305_v18, %v2504_v22  ;;  %v2631_v24 = vmax.f32 %v2513_v30, 0.0 }
 0x783   :  { %v3712_v36 = vpop.f32.mrf.mxu0 }
 0x784   :  { %v2629_v26 = vmax.f32 %v2505_v23, 0.0  ;;  %v2680_v42 = vpack.c.bf16 %v2631_v24, %v2630_v27  ;;  %v2526_v34 = vadd.f32 %v3712_v36, %v4305_v18 }
 0x785   :  { %v2517_v28 = vpop.f32.mrf.mxu0 }
 0x786   :  { %v2679_v29 = vpack.c.bf16 %v2629_v26, %v2628_v25  ;;  %v2518_v32 = vadd.f32 %v4305_v18, %v2517_v28  ;;  %v2634_v41 = vmax.f32 %v2526_v34, 0.0 }
 0x787   :  { %v3713_v31 = vpop.f32.mrf.mxu0 }
 0x788   :  { %v2529_v33 = vadd.f32 %v3713_v31, %v4305_v18  ;;  %3754 = vmatprep.mubr.bf16.mxu1 %v2679_v29  ;;  %v2632_v39 = vmax.f32 %v2518_v32, 0.0 }
 0x789   :  { %v2520_v35 = vpop.f32.mrf.mxu0  ;;  %3755 = vmatmul.mubr.bf16.vlgmr.msra.gmra.mxu1 %v2680_v42 }
 0x78a   :  { %v2521_v37 = vadd.f32 %v4305_v18, %v2520_v35  ;;  %v2635_v46 = vmax.f32 %v2529_v33, 0.0 }
 0x78b   :  { %v3716_v38 = vpop.f32.mrf.mxu0 }
 0x78c   :  { %v2633_v40 = vmax.f32 %v2521_v37, 0.0  ;;  %v2682_v44 = vpack.c.bf16 %v2635_v46, %v2634_v41  ;;  %v2542_v60 = vadd.f32 %v3716_v38, %v4305_v18 }
 0x78d   :  { %v2533_v54 = vpop.f32.mrf.mxu0 }
 0x78e   :  { %v2681_v43 = vpack.c.bf16 %v2633_v40, %v2632_v39  ;;  %v2534_v47 = vadd.f32 %v4305_v18, %v2533_v54  ;;  %v2638_v55 = vmax.f32 %v2542_v60, 0.0 }
 0x78f   :  { %v3717_v45 = vpop.f32.mrf.mxu0 }
 0x790   :  { %v2545_v48 = vadd.f32 %v3717_v45, %v4305_v18  ;;  %3758 = vmatprep.mubr.bf16.mxu1 %v2681_v43  ;;  %v2636_v53 = vmax.f32 %v2534_v47, 0.0 }
 0x791   :  { %v2536_v49 = vpop.f32.mrf.mxu0  ;;  %3759 = vmatmul.mubr.bf16.gmra.mxu1 %v2682_v44 }
 0x792   :  { %v2537_v50 = vadd.f32 %v4305_v18, %v2536_v49  ;;  %v2639_v51 = vmax.f32 %v2545_v48, 0.0 }
 0x793   :  { %v3720_v52 = vpop.f32.mrf.mxu0 }
 0x794   :  { %v2637_v2 = vmax.f32 %v2537_v50, 0.0  ;;  %v2684_v58 = vpack.c.bf16 %v2639_v51, %v2638_v55  ;;  %v2558_v62 = vadd.f32 %v3720_v52, %v4305_v18 }
 0x795   :  { %v2549_v56 = vpop.f32.mrf.mxu0 }
 0x796   :  { %v2683_v57 = vpack.c.bf16 %v2637_v2, %v2636_v53  ;;  %v2550_v9 = vadd.f32 %v4305_v18, %v2549_v56  ;;  %v2642_v6 = vmax.f32 %v2558_v62, 0.0 }
 0x797   :  { %v3721_v59 = vpop.f32.mrf.mxu0 }
 0x798   :  { %v2561_v61 = vadd.f32 %v3721_v59, %v4305_v18  ;;  %3762 = vmatprep.mubr.bf16.mxu1 %v2683_v57  ;;  %v2640_v4 = vmax.f32 %v2550_v9, 0.0 }
 0x799   :  { %v2552_v63 = vpop.f32.mrf.mxu0  ;;  %3763 = vmatmul.mubr.bf16.gmra.mxu1 %v2684_v58 }
 0x79a   :  { %v2553_v0 = vadd.f32 %v4305_v18, %v2552_v63  ;;  %v2643_v1 = vmax.f32 %v2561_v61, 0.0 }
 0x79b   :  { %v3724_v3 = vpop.f32.mrf.mxu0 }
 0x79c   :  { %v2641_v5 = vmax.f32 %v2553_v0, 0.0  ;;  %v2686_v10 = vpack.c.bf16 %v2643_v1, %v2642_v6  ;;  %v2574_v14 = vadd.f32 %v3724_v3, %v4305_v18 }
 0x79d   :  { %v2565_v7 = vpop.f32.mrf.mxu0 }
 0x79e   :  { %v2685_v8 = vpack.c.bf16 %v2641_v5, %v2640_v4  ;;  %v2566_v12 = vadd.f32 %v4305_v18, %v2565_v7  ;;  %v2646_v21 = vmax.f32 %v2574_v14, 0.0 }
 0x79f   :  { %v3725_v11 = vpop.f32.mrf.mxu0 }
 0x7a0   :  { %v2577_v13 = vadd.f32 %v3725_v11, %v4305_v18  ;;  %3766 = vmatprep.mubr.bf16.mxu1 %v2685_v8  ;;  %v2644_v20 = vmax.f32 %v2566_v12, 0.0 }
 0x7a1   :  { %v2568_v15 = vpop.f32.mrf.mxu0  ;;  %3767 = vmatmul.mubr.bf16.gmra.mxu1 %v2686_v10 }
 0x7a2   :  { %v2569_v16 = vadd.f32 %v4305_v18, %v2568_v15  ;;  %v2647_v17 = vmax.f32 %v2577_v13, 0.0 }
 0x7a3   :  { %v3728_v19 = vpop.f32.mrf.mxu0 }
 0x7a4   :  { %v2645_v30 = vmax.f32 %v2569_v16, 0.0  ;;  %v2688_v24 = vpack.c.bf16 %v2647_v17, %v2646_v21  ;;  %v2590_v27 = vadd.f32 %v3728_v19, %v4305_v18 }
 0x7a5   :  { %v2581_v22 = vpop.f32.mrf.mxu0 }
 0x7a6   :  { %v2687_v23 = vpack.c.bf16 %v2645_v30, %v2644_v20  ;;  %v2582_v25 = vadd.f32 %v4305_v18, %v2581_v22  ;;  %v2650_v34 = vmax.f32 %v2590_v27, 0.0 }
 0x7a7   :  { %v3729_v36 = vpop.f32.mrf.mxu0 }
 0x7a8   :  { %v2593_v26 = vadd.f32 %v3729_v36, %v4305_v18  ;;  %3770 = vmatprep.mubr.bf16.mxu1 %v2687_v23  ;;  %v2648_v32 = vmax.f32 %v2582_v25, 0.0 }
 0x7a9   :  { %v2584_v28 = vpop.f32.mrf.mxu0  ;;  %3771 = vmatmul.mubr.bf16.gmra.mxu1 %v2688_v24 }
 0x7aa   :  { %v2585_v29 = vadd.f32 %v4305_v18, %v2584_v28  ;;  %v2651_v42 = vmax.f32 %v2593_v26, 0.0 }
 0x7ab   :  { %v3732_v31 = vpop.f32.mrf.mxu0 }
 0x7ac   :  { %v2649_v33 = vmax.f32 %v2585_v29, 0.0  ;;  %v2690_v46 = vpack.c.bf16 %v2651_v42, %v2650_v34  ;;  %v2606_v41 = vadd.f32 %v3732_v31, %v4305_v18 }
 0x7ad   :  { %v2597_v35 = vpop.f32.mrf.mxu0 }
 0x7ae   :  { %v2689_v37 = vpack.c.bf16 %v2649_v33, %v2648_v32  ;;  %v2598_v39 = vadd.f32 %v4305_v18, %v2597_v35  ;;  %v2654_v60 = vmax.f32 %v2606_v41, 0.0 }
 0x7af   :  { %v3733_v38 = vpop.f32.mrf.mxu0 }
 0x7b0   :  { %v2609_v40 = vadd.f32 %v3733_v38, %v4305_v18  ;;  %3774 = vmatprep.mubr.bf16.mxu1 %v2689_v37  ;;  %v2652_v47 = vmax.f32 %v2598_v39, 0.0 }
 0x7b1   :  { %v2600_v54 = vpop.f32.mrf.mxu0  ;;  %3775 = vmatmul.mubr.bf16.gmra.mxu1 %v2690_v46 }
 0x7b2   :  { %v2601_v43 = vadd.f32 %v4305_v18, %v2600_v54  ;;  %v2655_v44 = vmax.f32 %v2609_v40, 0.0 }
 0x7b3   :  { %v3736_v45 = vpop.f32.mrf.mxu0 }
 0x7b4   :  { %v2653_v48 = vmax.f32 %v2601_v43, 0.0  ;;  %v2692_v51 = vpack.c.bf16 %v2655_v44, %v2654_v60  ;;  %v2622_v55 = vadd.f32 %v3736_v45, %v4305_v18 }
 0x7b5   :  { %v2613_v49 = vpop.f32.mrf.mxu0 }
 0x7b6   :  { %v2691_v50 = vpack.c.bf16 %v2653_v48, %v2652_v47  ;;  %v2614_v53 = vadd.f32 %v4305_v18, %v2613_v49  ;;  %v2658_v61 = vmax.f32 %v2622_v55, 0.0 }
 0x7b7   :  { %v3737_v52 = vpop.f32.mrf.mxu0 }
 0x7b8   :  { %v2625_v2 = vadd.f32 %v3737_v52, %v4305_v18  ;;  %3778 = vmatprep.mubr.bf16.mxu1 %v2691_v50  ;;  %v2656_v59 = vmax.f32 %v2614_v53, 0.0 }
 0x7b9   :  { %v2616_v56 = vpop.f32.mrf.mxu0  ;;  %3779 = vmatmul.mubr.bf16.gmra.mxu1 %v2692_v51 }
 0x7ba   :  { %v2617_v57 = vadd.f32 %v4305_v18, %v2616_v56  ;;  %v2659_v58 = vmax.f32 %v2625_v2, 0.0 }
 0x7bc   :  { %v2657_v9 = vmax.f32 %v2617_v57, 0.0  ;;  %v2694_v63 = vpack.c.bf16 %v2659_v58, %v2658_v61 }
 0x7be   :  { %v2693_v62 = vpack.c.bf16 %v2657_v9, %v2656_v59 }
 0x7c0   :  { %3782 = vmatprep.mubr.bf16.mxu1 %v2693_v62 }
 0x7c1   :  { %3783 = vmatmul.mubr.bf16.gmra.mxu1 %v2694_v63 }
 0x7c2   :  { %3948 = shalt.err (!%p3945_p5)
}
 0x7c3   :  { %2965 = dma.vmem_to_hbm [thread:$0]  %s2960_s2, 4096, %s4389_s4, [#allocation10], %s3989_s25, %s3989_s25, %s3990_s26   ;;  %v4345_v18 = vld [vmem:[#allocation7 + $0x9] ss:$0 sm:$0xff] }
 0x7c4   :  { %s3995_s4 = smov [#allocation8]  }
 0x7c5   :  { %s2947_s12 = sshll.u32 %s3995_s4, 4  ;;  %s2948_s12 = int_to_ptr.vmem [resolvable:$true] %s2947_s12 }
 0x7c6   :  { %s3957_s13 = scalar_lea.vmem %s2948_s12, 4096  ;;  %p3962_p7 = scmp.lt.s32.totalorder %s2948_s12, %s2948_s12 }
 0x7c7   :  { %p3958_p6 = scmp.ne.s32.totalorder %s2948_s12, %s3957_s13  ;;  %p3963_p8 = scmp.lt.s32.totalorder %s3957_s13, %s3957_s13 }
 0x7c9   :  { %p3964_p9 = por %p3963_p8, %p3962_p7 }
 0x7cb   :  { %p3965_p10 = pnand %p3964_p9, %p3958_p6 }
 0x849   :  { %v3756_v0 = vpop.f32.mrf.mxu1 }
 0x84a   :  { %v2792_v1 = vadd.f32 %v3756_v0, %v4345_v18 }
 0x84b   :  { %v2783_v3 = vpop.f32.mrf.mxu1 }
 0x84c   :  { %2912 = vst [vmem:[#allocation8 + $0x10] sm:$0xff] %v2792_v1  ;;  %v2784_v4 = vadd.f32 %v4345_v18, %v2783_v3 }
 0x84d   :  { %v3757_v5 = vpop.f32.mrf.mxu1 }
 0x84e   :  { %2910 = vst [vmem:[#allocation8] sm:$0xff] %v2784_v4  ;;  %v2795_v6 = vadd.f32 %v3757_v5, %v4345_v18 }
 0x84f   :  { %v2786_v7 = vpop.f32.mrf.mxu1 }
 0x850   :  { %2913 = vst [vmem:[#allocation8 + $0x18] sm:$0xff] %v2795_v6  ;;  %v2787_v8 = vadd.f32 %v4345_v18, %v2786_v7 }
 0x851   :  { %v3760_v10 = vpop.f32.mrf.mxu1 }
 0x852   :  { %2911 = vst [vmem:[#allocation8 + $0x8] sm:$0xff] %v2787_v8  ;;  %v2808_v11 = vadd.f32 %v3760_v10, %v4345_v18 }
 0x853   :  { %v2799_v12 = vpop.f32.mrf.mxu1 }
 0x854   :  { %2916 = vst [vmem:[#allocation8 + $0x30] sm:$0xff] %v2808_v11  ;;  %v2800_v13 = vadd.f32 %v4345_v18, %v2799_v12 }
 0x855   :  { %v3761_v14 = vpop.f32.mrf.mxu1 }
 0x856   :  { %2914 = vst [vmem:[#allocation8 + $0x20] sm:$0xff] %v2800_v13  ;;  %v2811_v15 = vadd.f32 %v3761_v14, %v4345_v18 }
 0x857   :  { %v2802_v16 = vpop.f32.mrf.mxu1 }
 0x858   :  { %2917 = vst [vmem:[#allocation8 + $0x38] sm:$0xff] %v2811_v15  ;;  %v2803_v17 = vadd.f32 %v4345_v18, %v2802_v16 }
 0x859   :  { %v3764_v19 = vpop.f32.mrf.mxu1 }
 0x85a   :  { %2915 = vst [vmem:[#allocation8 + $0x28] sm:$0xff] %v2803_v17  ;;  %v2824_v20 = vadd.f32 %v3764_v19, %v4345_v18 }
 0x85b   :  { %v2815_v30 = vpop.f32.mrf.mxu1 }
 0x85c   :  { %2920 = vst [vmem:[#allocation8 + $0x50] sm:$0xff] %v2824_v20  ;;  %v2816_v21 = vadd.f32 %v4345_v18, %v2815_v30 }
 0x85d   :  { %v3765_v22 = vpop.f32.mrf.mxu1 }
 0x85e   :  { %2918 = vst [vmem:[#allocation8 + $0x40] sm:$0xff] %v2816_v21  ;;  %v2827_v23 = vadd.f32 %v3765_v22, %v4345_v18 }
 0x85f   :  { %v2818_v24 = vpop.f32.mrf.mxu1 }
 0x860   :  { %2921 = vst [vmem:[#allocation8 + $0x58] sm:$0xff] %v2827_v23  ;;  %v2819_v36 = vadd.f32 %v4345_v18, %v2818_v24 }
 0x861   :  { %v3768_v25 = vpop.f32.mrf.mxu1 }
 0x862   :  { %2919 = vst [vmem:[#allocation8 + $0x48] sm:$0xff] %v2819_v36  ;;  %v2840_v26 = vadd.f32 %v3768_v25, %v4345_v18 }
 0x863   :  { %v2831_v27 = vpop.f32.mrf.mxu1 }
 0x864   :  { %2924 = vst [vmem:[#allocation8 + $0x70] sm:$0xff] %v2840_v26  ;;  %v2832_v28 = vadd.f32 %v4345_v18, %v2831_v27 }
 0x865   :  { %v3769_v29 = vpop.f32.mrf.mxu1 }
 0x866   :  { %2922 = vst [vmem:[#allocation8 + $0x60] sm:$0xff] %v2832_v28  ;;  %v2843_v42 = vadd.f32 %v3769_v29, %v4345_v18 }
 0x867   :  { %v2834_v31 = vpop.f32.mrf.mxu1 }
 0x868   :  { %2925 = vst [vmem:[#allocation8 + $0x78] sm:$0xff] %v2843_v42  ;;  %v2835_v32 = vadd.f32 %v4345_v18, %v2834_v31 }
 0x869   :  { %v3772_v33 = vpop.f32.mrf.mxu1 }
 0x86a   :  { %2923 = vst [vmem:[#allocation8 + $0x68] sm:$0xff] %v2835_v32  ;;  %v2856_v34 = vadd.f32 %v3772_v33, %v4345_v18 }
 0x86b   :  { %v2847_v35 = vpop.f32.mrf.mxu1 }
 0x86c   :  { %2928 = vst [vmem:[#allocation8 + $0x90] sm:$0xff] %v2856_v34  ;;  %v2848_v37 = vadd.f32 %v4345_v18, %v2847_v35 }
 0x86d   :  { %v3773_v46 = vpop.f32.mrf.mxu1 }
 0x86e   :  { %2926 = vst [vmem:[#allocation8 + $0x80] sm:$0xff] %v2848_v37  ;;  %v2859_v38 = vadd.f32 %v3773_v46, %v4345_v18 }
 0x86f   :  { %v2850_v39 = vpop.f32.mrf.mxu1 }
 0x870   :  { %2929 = vst [vmem:[#allocation8 + $0x98] sm:$0xff] %v2859_v38  ;;  %v2851_v40 = vadd.f32 %v4345_v18, %v2850_v39 }
 0x871   :  { %v3776_v41 = vpop.f32.mrf.mxu1 }
 0x872   :  { %2927 = vst [vmem:[#allocation8 + $0x88] sm:$0xff] %v2851_v40  ;;  %v2872_v54 = vadd.f32 %v3776_v41, %v4345_v18 }
 0x873   :  { %v2863_v43 = vpop.f32.mrf.mxu1 }
 0x874   :  { %2932 = vst [vmem:[#allocation8 + $0xb0] sm:$0xff] %v2872_v54  ;;  %v2864_v44 = vadd.f32 %v4345_v18, %v2863_v43 }
 0x875   :  { %v3777_v45 = vpop.f32.mrf.mxu1 }
 0x876   :  { %2930 = vst [vmem:[#allocation8 + $0xa0] sm:$0xff] %v2864_v44  ;;  %v2875_v47 = vadd.f32 %v3777_v45, %v4345_v18 }
 0x877   :  { %v2866_v48 = vpop.f32.mrf.mxu1 }
 0x878   :  { %2933 = vst [vmem:[#allocation8 + $0xb8] sm:$0xff] %v2875_v47  ;;  %v2867_v60 = vadd.f32 %v4345_v18, %v2866_v48 }
 0x879   :  { %v3780_v49 = vpop.f32.mrf.mxu1 }
 0x87a   :  { %2931 = vst [vmem:[#allocation8 + $0xa8] sm:$0xff] %v2867_v60  ;;  %v2888_v50 = vadd.f32 %v3780_v49, %v4345_v18 }
 0x87b   :  { %v2879_v51 = vpop.f32.mrf.mxu1 }
 0x87c   :  { %2936 = vst [vmem:[#allocation8 + $0xd0] sm:$0xff] %v2888_v50  ;;  %v2880_v52 = vadd.f32 %v4345_v18, %v2879_v51 }
 0x87d   :  { %v3781_v53 = vpop.f32.mrf.mxu1 }
 0x87e   :  { %2934 = vst [vmem:[#allocation8 + $0xc0] sm:$0xff] %v2880_v52  ;;  %v2891_v2 = vadd.f32 %v3781_v53, %v4345_v18 }
 0x87f   :  { %v2882_v55 = vpop.f32.mrf.mxu1 }
 0x880   :  { %2937 = vst [vmem:[#allocation8 + $0xd8] sm:$0xff] %v2891_v2  ;;  %v2883_v56 = vadd.f32 %v4345_v18, %v2882_v55 }
 0x881   :  { %v3784_v57 = vpop.f32.mrf.mxu1 }
 0x882   :  { %2935 = vst [vmem:[#allocation8 + $0xc8] sm:$0xff] %v2883_v56  ;;  %v2904_v58 = vadd.f32 %v3784_v57, %v4345_v18 }
 0x883   :  { %v2895_v59 = vpop.f32.mrf.mxu1 }
 0x884   :  { %2940 = vst [vmem:[#allocation8 + $0xf0] sm:$0xff] %v2904_v58  ;;  %v2896_v9 = vadd.f32 %v4345_v18, %v2895_v59 }
 0x885   :  { %v3785_v61 = vpop.f32.mrf.mxu1 }
 0x886   :  { %2938 = vst [vmem:[#allocation8 + $0xe0] sm:$0xff] %v2896_v9  ;;  %v2907_v62 = vadd.f32 %v3785_v61, %v4345_v18 }
 0x887   :  { %v2898_v63 = vpop.f32.mrf.mxu1 }
 0x888   :  { %2941 = vst [vmem:[#allocation8 + $0xf8] sm:$0xff] %v2907_v62  ;;  %v2899_v0 = vadd.f32 %v4345_v18, %v2898_v63 }
 0x88a   :  { %2939 = vst [vmem:[#allocation8 + $0xe8] sm:$0xff] %v2899_v0 }
 0x88b   :  { %3968 = shalt.err (!%p3965_p10)
}
 0x88c   :  { %2953 = dma.vmem_to_hbm [thread:$0]  %s2948_s12, 4096, %s4388_s3, [#allocation4], %s3989_s25, %s3989_s25, %s3990_s26  }
 0x88d   :  { %3981 = dma.done.wait [#allocation4], 4096  }
 0x88e   :  { %3982 = vsyncadd [#allocation4], 4294963200 }
 0x88f   :  { %3983 = dma.done.wait [#allocation10], 4096  }
 0x890   :  { %3984 = vsyncadd [#allocation10], 4294963200 }
 0x891   :  { %2972 = vsyncpa [#allocation3], 1 }
 0x892   :  { %2973 = vsyncpa [#allocation6], 1 }
 0x893   :  { %2974 = vsyncpa [#allocation4], 1 }
 0x894   :  { %2975 = vsyncpa [#allocation10], 1 }

</bundles_post_ra>
